<compile_context>
chip_gen: v7x
topology: tpu7x:2x2x1
jax: 0.10.0
libtpu: 0.0.40
codegen_flags: <defaults>
</compile_context>

<pallas_src>
import math

import numpy as np
import jax
import jax.numpy as jnp
from jax.experimental import pallas as pl
from jax.experimental.pallas import tpu as pltpu

# layer widths of the MLP: fc1..fc16
FC_DIMS = [8, 32, 30, 28, 26, 24, 22, 20, 18, 16, 14, 12, 10, 8, 6, 4, 2]
NUM_FC = len(FC_DIMS) - 1        # 16
FC_PAD = 32                      # every layer zero-padded to (32, 32)
DEFAULT_TILE_N = 2048            # batch lanes per grid step (multiple of 256)


def _round_up(x, m):
    return ((x + m - 1) // m) * m


# ----------------------------------------------------------------------------
# Host-side constant selector: folds conv(3x3, pad=1) + maxpool(2,2) geometry
# into a single (32, 16) matrix.
#   row r = k*8 + c*4 + q   with k = dh*2+dw (position inside pool window),
#                                q = ph*2+pw (pool window), c = out channel
#   col p = h*4 + w         (flattened 4x4 input pixel)
# ----------------------------------------------------------------------------
def _build_conv_selector():
    sel = np.zeros((4, 4, 3, 3, 16), np.float32)   # (k, q, di, dj, p)
    for dh in range(2):
        for dw in range(2):
            for ph in range(2):
                for pw in range(2):
                    for di in range(3):
                        for dj in range(3):
                            ih = 2 * ph + dh + di - 1
                            iw = 2 * pw + dw + dj - 1
                            if 0 <= ih < 4 and 0 <= iw < 4:
                                sel[dh * 2 + dw, ph * 2 + pw, di, dj,
                                    ih * 4 + iw] = 1.0
    return sel


_CONV_SELECTOR = _build_conv_selector()


# ----------------------------------------------------------------------------
# Parameter packing (done once, outside the per-call path)
# ----------------------------------------------------------------------------
def pack_params(wconv, bconv, fc_params):
    """-> (cmat bf16 (32,16), cbias f32 (32,1),
           wstack bf16 (16,32,32), bstack f32 (16,32,1))."""
    sel = jnp.asarray(_CONV_SELECTOR)                       # (4,4,3,3,16)
    cmat = jnp.einsum('cij,kqijp->kcqp',
                      wconv[:, 0].astype(jnp.float32), sel).reshape(32, 16)
    # cbias[k*8 + c*4 + q] = bconv[c]
    cbias = jnp.tile(jnp.repeat(bconv.astype(jnp.float32), 4), 4).reshape(32, 1)

    w_pad, b_pad = [], []
    for (w, b) in fc_params:
        out_d, in_d = w.shape
        w_pad.append(jnp.pad(w.astype(jnp.float32),
                             ((0, FC_PAD - out_d), (0, FC_PAD - in_d))))
        b_pad.append(jnp.pad(b.astype(jnp.float32), (0, FC_PAD - out_d)))
    wstack = jnp.stack(w_pad)                               # (16, 32, 32)
    bstack = jnp.stack(b_pad).reshape(NUM_FC, FC_PAD, 1)    # (16, 32, 1)

    return (cmat.astype(jnp.bfloat16), cbias,
            wstack.astype(jnp.bfloat16), bstack)


# ----------------------------------------------------------------------------
# Pallas kernel: conv-as-matmul + ReLU + maxpool + 16-layer padded MLP
#   x_ref    : (16, T)  bf16   flattened image pixels, batch on lanes
#   cmat_ref : (32, 16) bf16   conv+pool geometry matrix (4 slabs of 8 rows)
#   cbias_ref: (32, 1)  f32    conv bias per row
#   wfc_ref  : (16, 32, 32) bf16  zero-padded FC weights (out, in)
#   bfc_ref  : (16, 32, 1)  f32   zero-padded FC biases
#   out_ref  : (2, T)   f32    final logits, batch on lanes
# ----------------------------------------------------------------------------
def net_kernel(x_ref, cmat_ref, cbias_ref, wfc_ref, bfc_ref, out_ref):
    # conv for all 4 positions of every 2x2 pool window in ONE matmul
    conv = jnp.dot(cmat_ref[...], x_ref[...],
                   preferred_element_type=jnp.float32)       # (32, T) f32
    conv = jnp.maximum(conv + cbias_ref[...], 0.0)           # bias + ReLU

    # 2x2 max-pool = elementwise max over the 4 aligned 8-row slabs;
    # resulting rows are already in PyTorch flatten order c*4 + ph*2 + pw.
    feat = jnp.maximum(jnp.maximum(conv[0:8], conv[8:16]),
                       jnp.maximum(conv[16:24], conv[24:32]))  # (8, T)

    # pad features to 32 rows so every FC layer is an identical (32,32) matmul
    h = jnp.concatenate(
        [feat, jnp.zeros((FC_PAD - 8, feat.shape[1]), jnp.float32)], axis=0)

    for layer in range(NUM_FC):
        acc = jnp.dot(wfc_ref[layer], h.astype(jnp.bfloat16),
                      preferred_element_type=jnp.float32)    # (32, T) f32
        h = acc + bfc_ref[layer]
        if layer < NUM_FC - 1:
            h = jnp.maximum(h, 0.0)

    out_ref[...] = h[0:2, :]                                 # lane-dense store


# ----------------------------------------------------------------------------
# Wrapper: layout plumbing + pallas_call (1-D parallel grid over batch lanes)
# ----------------------------------------------------------------------------
def net_forward_pallas(x, packed, *, tile_n=DEFAULT_TILE_N):
    cmat, cbias, wstack, bstack = packed
    n = x.shape[0]

    # lane tile: multiple of 256 (feeds the 256-wide MXU on v6e/v7x, also a
    # multiple of 128 for v5e); keep it >= per-step-overhead amortization.
    tile = min(tile_n, _round_up(max(n, 1), 256))
    n_pad = _round_up(n, tile)

    # batch -> lane axis; bf16 halves the dominant HBM stream
    x_t = x.reshape(n, 16).T.astype(jnp.bfloat16)            # (16, n)
    x_t = jnp.pad(x_t, ((0, 0), (0, n_pad - n)))

    out = pl.pallas_call(
        net_kernel,
        out_shape=jax.ShapeDtypeStruct((2, n_pad), jnp.float32),
        grid=(n_pad // tile,),
        in_specs=[
            pl.BlockSpec((16, tile), lambda i: (0, i)),          # x (streamed)
            pl.BlockSpec((32, 16), lambda i: (0, 0)),            # cmat
            pl.BlockSpec((32, 1), lambda i: (0, 0)),             # cbias
            pl.BlockSpec((NUM_FC, FC_PAD, FC_PAD),
                         lambda i: (0, 0, 0)),                   # FC weights
            pl.BlockSpec((NUM_FC, FC_PAD, 1),
                         lambda i: (0, 0, 0)),                   # FC biases
        ],
        out_specs=pl.BlockSpec((2, tile), lambda i: (0, i)),
        compiler_params=pltpu.CompilerParams(
            dimension_semantics=("parallel",)),
    )(x_t, cmat, cbias, wstack, bstack)

    return out[:, :n].T                                      # back to (N, 2)


net_forward = jax.jit(net_forward_pallas, static_argnames=("tile_n",))


# ----------------------------------------------------------------------------
# Pure-JAX reference (PyTorch semantics, f32) for the correctness check
# ----------------------------------------------------------------------------
def net_forward_reference(x, wconv, bconv, fc_params):
    y = jax.lax.conv_general_dilated(
        x, wconv, window_strides=(1, 1), padding=((1, 1), (1, 1)),
        dimension_numbers=('NCHW', 'OIHW', 'NCHW'))
    y = y + bconv[None, :, None, None]
    y = jnp.maximum(y, 0.0)
    y = jax.lax.reduce_window(y, -jnp.inf, jax.lax.max,
                              (1, 1, 2, 2), (1, 1, 2, 2), 'VALID')
    h = y.reshape(x.shape[0], 8)
    for i, (w, b) in enumerate(fc_params):
        h = h @ w.T + b
        if i < NUM_FC - 1:
            h = jnp.maximum(h, 0.0)
    return h


# ----------------------------------------------------------------------------
def init_params(seed=42):
    key = jax.random.PRNGKey(seed)
    keys = jax.random.split(key, 2 + 2 * NUM_FC)
    wconv = jax.random.normal(keys[0], (2, 1, 3, 3), jnp.float32) * (1.0 / 3.0)
    bconv = jax.random.normal(keys[1], (2,), jnp.float32) * 0.1
    fc_params = []
    for i in range(NUM_FC):
        fan_in = FC_DIMS[i]
        w = jax.random.normal(keys[2 + 2 * i], (FC_DIMS[i + 1], fan_in),
                              jnp.float32) * (1.0 / math.sqrt(fan_in))
        b = jax.random.normal(keys[3 + 2 * i], (FC_DIMS[i + 1],),
                              jnp.float32) * 0.05
        fc_params.append((w, b))
    return wconv, bconv, fc_params


if __name__ == "__main__":
    # input implied by forward(): NCHW (batch=2, channels=1, 4x4 spatial)
    x = jax.random.normal(jax.random.PRNGKey(0), (2, 1, 4, 4), jnp.float32)
    wconv, bconv, fc_params = init_params()

    packed = pack_params(wconv, bconv, fc_params)   # hoisted out of call path
    out = net_forward(x, packed)
    out = jax.block_until_ready(out)

    ref = net_forward_reference(x, wconv, bconv, fc_params)
    assert out.shape == (2, 2), out.shape
    # bf16 matmul operands (f32 accumulation) -> slightly widened tolerance
    assert jnp.allclose(out, ref, rtol=2e-2, atol=2e-2), (out, ref)

    print("KERNEL_OK")
</pallas_src>

<mosaic_0001>
module attributes {stable_mosaic.version = 11 : i64} {
  func.func @net_kernel(%arg0: i32, %arg1: memref<16x256xbf16, #tpu.memory_space<vmem>>, %arg2: memref<32x16xbf16, #tpu.memory_space<vmem>>, %arg3: memref<32x1xf32, #tpu.memory_space<vmem>>, %arg4: memref<16x32x32xbf16, #tpu.memory_space<vmem>>, %arg5: memref<16x32x1xf32, #tpu.memory_space<vmem>>, %arg6: memref<2x256xf32, #tpu.memory_space<vmem>>) attributes {dimension_semantics = [#tpu.dimension_semantics<parallel>], iteration_bounds = array<i64: 1>, scalar_prefetch = 0 : i64, scratch_operands = 0 : i64, tpu.core_type = #tpu.core_type<tc>, window_params = [{transform_indices = @transform_0, window_bounds = array<i64: 16, 256>}, {pipeline_mode = #tpu.pipeline_mode<synchronous>, transform_indices = @transform_1, window_bounds = array<i64: 32, 16>}, {pipeline_mode = #tpu.pipeline_mode<synchronous>, transform_indices = @transform_2, window_bounds = array<i64: 32, 1>}, {pipeline_mode = #tpu.pipeline_mode<synchronous>, transform_indices = @transform_3, window_bounds = array<i64: 16, 32, 32>}, {pipeline_mode = #tpu.pipeline_mode<synchronous>, transform_indices = @transform_4, window_bounds = array<i64: 16, 32, 1>}, {transform_indices = @transform_5, window_bounds = array<i64: 2, 256>}]} {
    %c0 = arith.constant 0 : index
    %c0_0 = arith.constant 0 : index
    %0 = vector.load %arg2[%c0, %c0_0] : memref<32x16xbf16, #tpu.memory_space<vmem>>, vector<32x16xbf16>
    %c0_1 = arith.constant 0 : index
    %c0_2 = arith.constant 0 : index
    %1 = vector.load %arg1[%c0_1, %c0_2] : memref<16x256xbf16, #tpu.memory_space<vmem>>, vector<16x256xbf16>
    %cst = arith.constant dense<0.000000e+00> : vector<32x256xf32>
    %2 = tpu.matmul %0, %1, %cst {dimension_numbers = #tpu.dot_dimension_numbers<[1], [0], [0], [1], [0, 0, 1, 1], [], []>} : vector<32x16xbf16>, vector<16x256xbf16>, vector<32x256xf32> -> vector<32x256xf32>
    %c0_3 = arith.constant 0 : index
    %c0_4 = arith.constant 0 : index
    %3 = vector.load %arg3[%c0_3, %c0_4] : memref<32x1xf32, #tpu.memory_space<vmem>>, vector<32x1xf32>
    %4 = vector.broadcast %3 : vector<32x1xf32> to vector<32x256xf32>
    %5 = arith.addf %2, %4 : vector<32x256xf32>
    %cst_5 = arith.constant 0.000000e+00 : f32
    %6 = vector.broadcast %cst_5 : f32 to vector<32x256xf32>
    %7 = arith.maximumf %5, %6 : vector<32x256xf32>
    %8 = vector.extract_strided_slice %7 {offsets = [0, 0], sizes = [8, 256], strides = [1, 1]} : vector<32x256xf32> to vector<8x256xf32>
    %9 = vector.extract_strided_slice %7 {offsets = [8, 0], sizes = [8, 256], strides = [1, 1]} : vector<32x256xf32> to vector<8x256xf32>
    %10 = arith.maximumf %8, %9 : vector<8x256xf32>
    %11 = vector.extract_strided_slice %7 {offsets = [16, 0], sizes = [8, 256], strides = [1, 1]} : vector<32x256xf32> to vector<8x256xf32>
    %12 = vector.extract_strided_slice %7 {offsets = [24, 0], sizes = [8, 256], strides = [1, 1]} : vector<32x256xf32> to vector<8x256xf32>
    %13 = arith.maximumf %11, %12 : vector<8x256xf32>
    %14 = arith.maximumf %10, %13 : vector<8x256xf32>
    %cst_6 = arith.constant 0.000000e+00 : f32
    %15 = vector.broadcast %cst_6 : f32 to vector<24x256xf32>
    %16 = tpu.concatenate %14, %15 in 0 : vector<8x256xf32>, vector<24x256xf32> -> vector<32x256xf32>
    %c0_7 = arith.constant 0 : index
    %c0_8 = arith.constant 0 : index
    %c0_9 = arith.constant 0 : index
    %17 = vector.load %arg4[%c0_7, %c0_8, %c0_9] : memref<16x32x32xbf16, #tpu.memory_space<vmem>>, vector<1x32x32xbf16>
    %18 = vector.shape_cast %17 : vector<1x32x32xbf16> to vector<32x32xbf16>
    %19 = arith.truncf %16 : vector<32x256xf32> to vector<32x256xbf16>
    %cst_10 = arith.constant dense<0.000000e+00> : vector<32x256xf32>
    %20 = tpu.matmul %18, %19, %cst_10 {dimension_numbers = #tpu.dot_dimension_numbers<[1], [0], [0], [1], [0, 0, 1, 1], [], []>} : vector<32x32xbf16>, vector<32x256xbf16>, vector<32x256xf32> -> vector<32x256xf32>
    %c0_11 = arith.constant 0 : index
    %c0_12 = arith.constant 0 : index
    %c0_13 = arith.constant 0 : index
    %21 = vector.load %arg5[%c0_11, %c0_12, %c0_13] : memref<16x32x1xf32, #tpu.memory_space<vmem>>, vector<1x32x1xf32>
    %22 = vector.shape_cast %21 : vector<1x32x1xf32> to vector<32x1xf32>
    %23 = vector.broadcast %22 : vector<32x1xf32> to vector<32x256xf32>
    %24 = arith.addf %20, %23 : vector<32x256xf32>
    %cst_14 = arith.constant 0.000000e+00 : f32
    %25 = vector.broadcast %cst_14 : f32 to vector<32x256xf32>
    %26 = arith.maximumf %24, %25 : vector<32x256xf32>
    %c1 = arith.constant 1 : index
    %c0_15 = arith.constant 0 : index
    %c0_16 = arith.constant 0 : index
    %27 = vector.load %arg4[%c1, %c0_15, %c0_16] : memref<16x32x32xbf16, #tpu.memory_space<vmem>>, vector<1x32x32xbf16>
    %28 = vector.shape_cast %27 : vector<1x32x32xbf16> to vector<32x32xbf16>
    %29 = arith.truncf %26 : vector<32x256xf32> to vector<32x256xbf16>
    %cst_17 = arith.constant dense<0.000000e+00> : vector<32x256xf32>
    %30 = tpu.matmul %28, %29, %cst_17 {dimension_numbers = #tpu.dot_dimension_numbers<[1], [0], [0], [1], [0, 0, 1, 1], [], []>} : vector<32x32xbf16>, vector<32x256xbf16>, vector<32x256xf32> -> vector<32x256xf32>
    %c1_18 = arith.constant 1 : index
    %c0_19 = arith.constant 0 : index
    %c0_20 = arith.constant 0 : index
    %31 = vector.load %arg5[%c1_18, %c0_19, %c0_20] : memref<16x32x1xf32, #tpu.memory_space<vmem>>, vector<1x32x1xf32>
    %32 = vector.shape_cast %31 : vector<1x32x1xf32> to vector<32x1xf32>
    %33 = vector.broadcast %32 : vector<32x1xf32> to vector<32x256xf32>
    %34 = arith.addf %30, %33 : vector<32x256xf32>
    %cst_21 = arith.constant 0.000000e+00 : f32
    %35 = vector.broadcast %cst_21 : f32 to vector<32x256xf32>
    %36 = arith.maximumf %34, %35 : vector<32x256xf32>
    %c2 = arith.constant 2 : index
    %c0_22 = arith.constant 0 : index
    %c0_23 = arith.constant 0 : index
    %37 = vector.load %arg4[%c2, %c0_22, %c0_23] : memref<16x32x32xbf16, #tpu.memory_space<vmem>>, vector<1x32x32xbf16>
    %38 = vector.shape_cast %37 : vector<1x32x32xbf16> to vector<32x32xbf16>
    %39 = arith.truncf %36 : vector<32x256xf32> to vector<32x256xbf16>
    %cst_24 = arith.constant dense<0.000000e+00> : vector<32x256xf32>
    %40 = tpu.matmul %38, %39, %cst_24 {dimension_numbers = #tpu.dot_dimension_numbers<[1], [0], [0], [1], [0, 0, 1, 1], [], []>} : vector<32x32xbf16>, vector<32x256xbf16>, vector<32x256xf32> -> vector<32x256xf32>
    %c2_25 = arith.constant 2 : index
    %c0_26 = arith.constant 0 : index
    %c0_27 = arith.constant 0 : index
    %41 = vector.load %arg5[%c2_25, %c0_26, %c0_27] : memref<16x32x1xf32, #tpu.memory_space<vmem>>, vector<1x32x1xf32>
    %42 = vector.shape_cast %41 : vector<1x32x1xf32> to vector<32x1xf32>
    %43 = vector.broadcast %42 : vector<32x1xf32> to vector<32x256xf32>
    %44 = arith.addf %40, %43 : vector<32x256xf32>
    %cst_28 = arith.constant 0.000000e+00 : f32
    %45 = vector.broadcast %cst_28 : f32 to vector<32x256xf32>
    %46 = arith.maximumf %44, %45 : vector<32x256xf32>
    %c3 = arith.constant 3 : index
    %c0_29 = arith.constant 0 : index
    %c0_30 = arith.constant 0 : index
    %47 = vector.load %arg4[%c3, %c0_29, %c0_30] : memref<16x32x32xbf16, #tpu.memory_space<vmem>>, vector<1x32x32xbf16>
    %48 = vector.shape_cast %47 : vector<1x32x32xbf16> to vector<32x32xbf16>
    %49 = arith.truncf %46 : vector<32x256xf32> to vector<32x256xbf16>
    %cst_31 = arith.constant dense<0.000000e+00> : vector<32x256xf32>
    %50 = tpu.matmul %48, %49, %cst_31 {dimension_numbers = #tpu.dot_dimension_numbers<[1], [0], [0], [1], [0, 0, 1, 1], [], []>} : vector<32x32xbf16>, vector<32x256xbf16>, vector<32x256xf32> -> vector<32x256xf32>
    %c3_32 = arith.constant 3 : index
    %c0_33 = arith.constant 0 : index
    %c0_34 = arith.constant 0 : index
    %51 = vector.load %arg5[%c3_32, %c0_33, %c0_34] : memref<16x32x1xf32, #tpu.memory_space<vmem>>, vector<1x32x1xf32>
    %52 = vector.shape_cast %51 : vector<1x32x1xf32> to vector<32x1xf32>
    %53 = vector.broadcast %52 : vector<32x1xf32> to vector<32x256xf32>
    %54 = arith.addf %50, %53 : vector<32x256xf32>
    %cst_35 = arith.constant 0.000000e+00 : f32
    %55 = vector.broadcast %cst_35 : f32 to vector<32x256xf32>
    %56 = arith.maximumf %54, %55 : vector<32x256xf32>
    %c4 = arith.constant 4 : index
    %c0_36 = arith.constant 0 : index
    %c0_37 = arith.constant 0 : index
    %57 = vector.load %arg4[%c4, %c0_36, %c0_37] : memref<16x32x32xbf16, #tpu.memory_space<vmem>>, vector<1x32x32xbf16>
    %58 = vector.shape_cast %57 : vector<1x32x32xbf16> to vector<32x32xbf16>
    %59 = arith.truncf %56 : vector<32x256xf32> to vector<32x256xbf16>
    %cst_38 = arith.constant dense<0.000000e+00> : vector<32x256xf32>
    %60 = tpu.matmul %58, %59, %cst_38 {dimension_numbers = #tpu.dot_dimension_numbers<[1], [0], [0], [1], [0, 0, 1, 1], [], []>} : vector<32x32xbf16>, vector<32x256xbf16>, vector<32x256xf32> -> vector<32x256xf32>
    %c4_39 = arith.constant 4 : index
    %c0_40 = arith.constant 0 : index
    %c0_41 = arith.constant 0 : index
    %61 = vector.load %arg5[%c4_39, %c0_40, %c0_41] : memref<16x32x1xf32, #tpu.memory_space<vmem>>, vector<1x32x1xf32>
    %62 = vector.shape_cast %61 : vector<1x32x1xf32> to vector<32x1xf32>
    %63 = vector.broadcast %62 : vector<32x1xf32> to vector<32x256xf32>
    %64 = arith.addf %60, %63 : vector<32x256xf32>
    %cst_42 = arith.constant 0.000000e+00 : f32
    %65 = vector.broadcast %cst_42 : f32 to vector<32x256xf32>
    %66 = arith.maximumf %64, %65 : vector<32x256xf32>
    %c5 = arith.constant 5 : index
    %c0_43 = arith.constant 0 : index
    %c0_44 = arith.constant 0 : index
    %67 = vector.load %arg4[%c5, %c0_43, %c0_44] : memref<16x32x32xbf16, #tpu.memory_space<vmem>>, vector<1x32x32xbf16>
    %68 = vector.shape_cast %67 : vector<1x32x32xbf16> to vector<32x32xbf16>
    %69 = arith.truncf %66 : vector<32x256xf32> to vector<32x256xbf16>
    %cst_45 = arith.constant dense<0.000000e+00> : vector<32x256xf32>
    %70 = tpu.matmul %68, %69, %cst_45 {dimension_numbers = #tpu.dot_dimension_numbers<[1], [0], [0], [1], [0, 0, 1, 1], [], []>} : vector<32x32xbf16>, vector<32x256xbf16>, vector<32x256xf32> -> vector<32x256xf32>
    %c5_46 = arith.constant 5 : index
    %c0_47 = arith.constant 0 : index
    %c0_48 = arith.constant 0 : index
    %71 = vector.load %arg5[%c5_46, %c0_47, %c0_48] : memref<16x32x1xf32, #tpu.memory_space<vmem>>, vector<1x32x1xf32>
    %72 = vector.shape_cast %71 : vector<1x32x1xf32> to vector<32x1xf32>
    %73 = vector.broadcast %72 : vector<32x1xf32> to vector<32x256xf32>
    %74 = arith.addf %70, %73 : vector<32x256xf32>
    %cst_49 = arith.constant 0.000000e+00 : f32
    %75 = vector.broadcast %cst_49 : f32 to vector<32x256xf32>
    %76 = arith.maximumf %74, %75 : vector<32x256xf32>
    %c6 = arith.constant 6 : index
    %c0_50 = arith.constant 0 : index
    %c0_51 = arith.constant 0 : index
    %77 = vector.load %arg4[%c6, %c0_50, %c0_51] : memref<16x32x32xbf16, #tpu.memory_space<vmem>>, vector<1x32x32xbf16>
    %78 = vector.shape_cast %77 : vector<1x32x32xbf16> to vector<32x32xbf16>
    %79 = arith.truncf %76 : vector<32x256xf32> to vector<32x256xbf16>
    %cst_52 = arith.constant dense<0.000000e+00> : vector<32x256xf32>
    %80 = tpu.matmul %78, %79, %cst_52 {dimension_numbers = #tpu.dot_dimension_numbers<[1], [0], [0], [1], [0, 0, 1, 1], [], []>} : vector<32x32xbf16>, vector<32x256xbf16>, vector<32x256xf32> -> vector<32x256xf32>
    %c6_53 = arith.constant 6 : index
    %c0_54 = arith.constant 0 : index
    %c0_55 = arith.constant 0 : index
    %81 = vector.load %arg5[%c6_53, %c0_54, %c0_55] : memref<16x32x1xf32, #tpu.memory_space<vmem>>, vector<1x32x1xf32>
    %82 = vector.shape_cast %81 : vector<1x32x1xf32> to vector<32x1xf32>
    %83 = vector.broadcast %82 : vector<32x1xf32> to vector<32x256xf32>
    %84 = arith.addf %80, %83 : vector<32x256xf32>
    %cst_56 = arith.constant 0.000000e+00 : f32
    %85 = vector.broadcast %cst_56 : f32 to vector<32x256xf32>
    %86 = arith.maximumf %84, %85 : vector<32x256xf32>
    %c7 = arith.constant 7 : index
    %c0_57 = arith.constant 0 : index
    %c0_58 = arith.constant 0 : index
    %87 = vector.load %arg4[%c7, %c0_57, %c0_58] : memref<16x32x32xbf16, #tpu.memory_space<vmem>>, vector<1x32x32xbf16>
    %88 = vector.shape_cast %87 : vector<1x32x32xbf16> to vector<32x32xbf16>
    %89 = arith.truncf %86 : vector<32x256xf32> to vector<32x256xbf16>
    %cst_59 = arith.constant dense<0.000000e+00> : vector<32x256xf32>
    %90 = tpu.matmul %88, %89, %cst_59 {dimension_numbers = #tpu.dot_dimension_numbers<[1], [0], [0], [1], [0, 0, 1, 1], [], []>} : vector<32x32xbf16>, vector<32x256xbf16>, vector<32x256xf32> -> vector<32x256xf32>
    %c7_60 = arith.constant 7 : index
    %c0_61 = arith.constant 0 : index
    %c0_62 = arith.constant 0 : index
    %91 = vector.load %arg5[%c7_60, %c0_61, %c0_62] : memref<16x32x1xf32, #tpu.memory_space<vmem>>, vector<1x32x1xf32>
    %92 = vector.shape_cast %91 : vector<1x32x1xf32> to vector<32x1xf32>
    %93 = vector.broadcast %92 : vector<32x1xf32> to vector<32x256xf32>
    %94 = arith.addf %90, %93 : vector<32x256xf32>
    %cst_63 = arith.constant 0.000000e+00 : f32
    %95 = vector.broadcast %cst_63 : f32 to vector<32x256xf32>
    %96 = arith.maximumf %94, %95 : vector<32x256xf32>
    %c8 = arith.constant 8 : index
    %c0_64 = arith.constant 0 : index
    %c0_65 = arith.constant 0 : index
    %97 = vector.load %arg4[%c8, %c0_64, %c0_65] : memref<16x32x32xbf16, #tpu.memory_space<vmem>>, vector<1x32x32xbf16>
    %98 = vector.shape_cast %97 : vector<1x32x32xbf16> to vector<32x32xbf16>
    %99 = arith.truncf %96 : vector<32x256xf32> to vector<32x256xbf16>
    %cst_66 = arith.constant dense<0.000000e+00> : vector<32x256xf32>
    %100 = tpu.matmul %98, %99, %cst_66 {dimension_numbers = #tpu.dot_dimension_numbers<[1], [0], [0], [1], [0, 0, 1, 1], [], []>} : vector<32x32xbf16>, vector<32x256xbf16>, vector<32x256xf32> -> vector<32x256xf32>
    %c8_67 = arith.constant 8 : index
    %c0_68 = arith.constant 0 : index
    %c0_69 = arith.constant 0 : index
    %101 = vector.load %arg5[%c8_67, %c0_68, %c0_69] : memref<16x32x1xf32, #tpu.memory_space<vmem>>, vector<1x32x1xf32>
    %102 = vector.shape_cast %101 : vector<1x32x1xf32> to vector<32x1xf32>
    %103 = vector.broadcast %102 : vector<32x1xf32> to vector<32x256xf32>
    %104 = arith.addf %100, %103 : vector<32x256xf32>
    %cst_70 = arith.constant 0.000000e+00 : f32
    %105 = vector.broadcast %cst_70 : f32 to vector<32x256xf32>
    %106 = arith.maximumf %104, %105 : vector<32x256xf32>
    %c9 = arith.constant 9 : index
    %c0_71 = arith.constant 0 : index
    %c0_72 = arith.constant 0 : index
    %107 = vector.load %arg4[%c9, %c0_71, %c0_72] : memref<16x32x32xbf16, #tpu.memory_space<vmem>>, vector<1x32x32xbf16>
    %108 = vector.shape_cast %107 : vector<1x32x32xbf16> to vector<32x32xbf16>
    %109 = arith.truncf %106 : vector<32x256xf32> to vector<32x256xbf16>
    %cst_73 = arith.constant dense<0.000000e+00> : vector<32x256xf32>
    %110 = tpu.matmul %108, %109, %cst_73 {dimension_numbers = #tpu.dot_dimension_numbers<[1], [0], [0], [1], [0, 0, 1, 1], [], []>} : vector<32x32xbf16>, vector<32x256xbf16>, vector<32x256xf32> -> vector<32x256xf32>
    %c9_74 = arith.constant 9 : index
    %c0_75 = arith.constant 0 : index
    %c0_76 = arith.constant 0 : index
    %111 = vector.load %arg5[%c9_74, %c0_75, %c0_76] : memref<16x32x1xf32, #tpu.memory_space<vmem>>, vector<1x32x1xf32>
    %112 = vector.shape_cast %111 : vector<1x32x1xf32> to vector<32x1xf32>
    %113 = vector.broadcast %112 : vector<32x1xf32> to vector<32x256xf32>
    %114 = arith.addf %110, %113 : vector<32x256xf32>
    %cst_77 = arith.constant 0.000000e+00 : f32
    %115 = vector.broadcast %cst_77 : f32 to vector<32x256xf32>
    %116 = arith.maximumf %114, %115 : vector<32x256xf32>
    %c10 = arith.constant 10 : index
    %c0_78 = arith.constant 0 : index
    %c0_79 = arith.constant 0 : index
    %117 = vector.load %arg4[%c10, %c0_78, %c0_79] : memref<16x32x32xbf16, #tpu.memory_space<vmem>>, vector<1x32x32xbf16>
    %118 = vector.shape_cast %117 : vector<1x32x32xbf16> to vector<32x32xbf16>
    %119 = arith.truncf %116 : vector<32x256xf32> to vector<32x256xbf16>
    %cst_80 = arith.constant dense<0.000000e+00> : vector<32x256xf32>
    %120 = tpu.matmul %118, %119, %cst_80 {dimension_numbers = #tpu.dot_dimension_numbers<[1], [0], [0], [1], [0, 0, 1, 1], [], []>} : vector<32x32xbf16>, vector<32x256xbf16>, vector<32x256xf32> -> vector<32x256xf32>
    %c10_81 = arith.constant 10 : index
    %c0_82 = arith.constant 0 : index
    %c0_83 = arith.constant 0 : index
    %121 = vector.load %arg5[%c10_81, %c0_82, %c0_83] : memref<16x32x1xf32, #tpu.memory_space<vmem>>, vector<1x32x1xf32>
    %122 = vector.shape_cast %121 : vector<1x32x1xf32> to vector<32x1xf32>
    %123 = vector.broadcast %122 : vector<32x1xf32> to vector<32x256xf32>
    %124 = arith.addf %120, %123 : vector<32x256xf32>
    %cst_84 = arith.constant 0.000000e+00 : f32
    %125 = vector.broadcast %cst_84 : f32 to vector<32x256xf32>
    %126 = arith.maximumf %124, %125 : vector<32x256xf32>
    %c11 = arith.constant 11 : index
    %c0_85 = arith.constant 0 : index
    %c0_86 = arith.constant 0 : index
    %127 = vector.load %arg4[%c11, %c0_85, %c0_86] : memref<16x32x32xbf16, #tpu.memory_space<vmem>>, vector<1x32x32xbf16>
    %128 = vector.shape_cast %127 : vector<1x32x32xbf16> to vector<32x32xbf16>
    %129 = arith.truncf %126 : vector<32x256xf32> to vector<32x256xbf16>
    %cst_87 = arith.constant dense<0.000000e+00> : vector<32x256xf32>
    %130 = tpu.matmul %128, %129, %cst_87 {dimension_numbers = #tpu.dot_dimension_numbers<[1], [0], [0], [1], [0, 0, 1, 1], [], []>} : vector<32x32xbf16>, vector<32x256xbf16>, vector<32x256xf32> -> vector<32x256xf32>
    %c11_88 = arith.constant 11 : index
    %c0_89 = arith.constant 0 : index
    %c0_90 = arith.constant 0 : index
    %131 = vector.load %arg5[%c11_88, %c0_89, %c0_90] : memref<16x32x1xf32, #tpu.memory_space<vmem>>, vector<1x32x1xf32>
    %132 = vector.shape_cast %131 : vector<1x32x1xf32> to vector<32x1xf32>
    %133 = vector.broadcast %132 : vector<32x1xf32> to vector<32x256xf32>
    %134 = arith.addf %130, %133 : vector<32x256xf32>
    %cst_91 = arith.constant 0.000000e+00 : f32
    %135 = vector.broadcast %cst_91 : f32 to vector<32x256xf32>
    %136 = arith.maximumf %134, %135 : vector<32x256xf32>
    %c12 = arith.constant 12 : index
    %c0_92 = arith.constant 0 : index
    %c0_93 = arith.constant 0 : index
    %137 = vector.load %arg4[%c12, %c0_92, %c0_93] : memref<16x32x32xbf16, #tpu.memory_space<vmem>>, vector<1x32x32xbf16>
    %138 = vector.shape_cast %137 : vector<1x32x32xbf16> to vector<32x32xbf16>
    %139 = arith.truncf %136 : vector<32x256xf32> to vector<32x256xbf16>
    %cst_94 = arith.constant dense<0.000000e+00> : vector<32x256xf32>
    %140 = tpu.matmul %138, %139, %cst_94 {dimension_numbers = #tpu.dot_dimension_numbers<[1], [0], [0], [1], [0, 0, 1, 1], [], []>} : vector<32x32xbf16>, vector<32x256xbf16>, vector<32x256xf32> -> vector<32x256xf32>
    %c12_95 = arith.constant 12 : index
    %c0_96 = arith.constant 0 : index
    %c0_97 = arith.constant 0 : index
    %141 = vector.load %arg5[%c12_95, %c0_96, %c0_97] : memref<16x32x1xf32, #tpu.memory_space<vmem>>, vector<1x32x1xf32>
    %142 = vector.shape_cast %141 : vector<1x32x1xf32> to vector<32x1xf32>
    %143 = vector.broadcast %142 : vector<32x1xf32> to vector<32x256xf32>
    %144 = arith.addf %140, %143 : vector<32x256xf32>
    %cst_98 = arith.constant 0.000000e+00 : f32
    %145 = vector.broadcast %cst_98 : f32 to vector<32x256xf32>
    %146 = arith.maximumf %144, %145 : vector<32x256xf32>
    %c13 = arith.constant 13 : index
    %c0_99 = arith.constant 0 : index
    %c0_100 = arith.constant 0 : index
    %147 = vector.load %arg4[%c13, %c0_99, %c0_100] : memref<16x32x32xbf16, #tpu.memory_space<vmem>>, vector<1x32x32xbf16>
    %148 = vector.shape_cast %147 : vector<1x32x32xbf16> to vector<32x32xbf16>
    %149 = arith.truncf %146 : vector<32x256xf32> to vector<32x256xbf16>
    %cst_101 = arith.constant dense<0.000000e+00> : vector<32x256xf32>
    %150 = tpu.matmul %148, %149, %cst_101 {dimension_numbers = #tpu.dot_dimension_numbers<[1], [0], [0], [1], [0, 0, 1, 1], [], []>} : vector<32x32xbf16>, vector<32x256xbf16>, vector<32x256xf32> -> vector<32x256xf32>
    %c13_102 = arith.constant 13 : index
    %c0_103 = arith.constant 0 : index
    %c0_104 = arith.constant 0 : index
    %151 = vector.load %arg5[%c13_102, %c0_103, %c0_104] : memref<16x32x1xf32, #tpu.memory_space<vmem>>, vector<1x32x1xf32>
    %152 = vector.shape_cast %151 : vector<1x32x1xf32> to vector<32x1xf32>
    %153 = vector.broadcast %152 : vector<32x1xf32> to vector<32x256xf32>
    %154 = arith.addf %150, %153 : vector<32x256xf32>
    %cst_105 = arith.constant 0.000000e+00 : f32
    %155 = vector.broadcast %cst_105 : f32 to vector<32x256xf32>
    %156 = arith.maximumf %154, %155 : vector<32x256xf32>
    %c14 = arith.constant 14 : index
    %c0_106 = arith.constant 0 : index
    %c0_107 = arith.constant 0 : index
    %157 = vector.load %arg4[%c14, %c0_106, %c0_107] : memref<16x32x32xbf16, #tpu.memory_space<vmem>>, vector<1x32x32xbf16>
    %158 = vector.shape_cast %157 : vector<1x32x32xbf16> to vector<32x32xbf16>
    %159 = arith.truncf %156 : vector<32x256xf32> to vector<32x256xbf16>
    %cst_108 = arith.constant dense<0.000000e+00> : vector<32x256xf32>
    %160 = tpu.matmul %158, %159, %cst_108 {dimension_numbers = #tpu.dot_dimension_numbers<[1], [0], [0], [1], [0, 0, 1, 1], [], []>} : vector<32x32xbf16>, vector<32x256xbf16>, vector<32x256xf32> -> vector<32x256xf32>
    %c14_109 = arith.constant 14 : index
    %c0_110 = arith.constant 0 : index
    %c0_111 = arith.constant 0 : index
    %161 = vector.load %arg5[%c14_109, %c0_110, %c0_111] : memref<16x32x1xf32, #tpu.memory_space<vmem>>, vector<1x32x1xf32>
    %162 = vector.shape_cast %161 : vector<1x32x1xf32> to vector<32x1xf32>
    %163 = vector.broadcast %162 : vector<32x1xf32> to vector<32x256xf32>
    %164 = arith.addf %160, %163 : vector<32x256xf32>
    %cst_112 = arith.constant 0.000000e+00 : f32
    %165 = vector.broadcast %cst_112 : f32 to vector<32x256xf32>
    %166 = arith.maximumf %164, %165 : vector<32x256xf32>
    %c15 = arith.constant 15 : index
    %c0_113 = arith.constant 0 : index
    %c0_114 = arith.constant 0 : index
    %167 = vector.load %arg4[%c15, %c0_113, %c0_114] : memref<16x32x32xbf16, #tpu.memory_space<vmem>>, vector<1x32x32xbf16>
    %168 = vector.shape_cast %167 : vector<1x32x32xbf16> to vector<32x32xbf16>
    %169 = arith.truncf %166 : vector<32x256xf32> to vector<32x256xbf16>
    %cst_115 = arith.constant dense<0.000000e+00> : vector<32x256xf32>
    %170 = tpu.matmul %168, %169, %cst_115 {dimension_numbers = #tpu.dot_dimension_numbers<[1], [0], [0], [1], [0, 0, 1, 1], [], []>} : vector<32x32xbf16>, vector<32x256xbf16>, vector<32x256xf32> -> vector<32x256xf32>
    %c15_116 = arith.constant 15 : index
    %c0_117 = arith.constant 0 : index
    %c0_118 = arith.constant 0 : index
    %171 = vector.load %arg5[%c15_116, %c0_117, %c0_118] : memref<16x32x1xf32, #tpu.memory_space<vmem>>, vector<1x32x1xf32>
    %172 = vector.shape_cast %171 : vector<1x32x1xf32> to vector<32x1xf32>
    %173 = vector.broadcast %172 : vector<32x1xf32> to vector<32x256xf32>
    %174 = arith.addf %170, %173 : vector<32x256xf32>
    %175 = vector.extract_strided_slice %174 {offsets = [0, 0], sizes = [2, 256], strides = [1, 1]} : vector<32x256xf32> to vector<2x256xf32>
    %c0_119 = arith.constant 0 : index
    %c0_120 = arith.constant 0 : index
    %176 = vector.load %arg6[%c0_119, %c0_120] : memref<2x256xf32, #tpu.memory_space<vmem>>, vector<2x256xf32>
    tpu.vector_store %arg6[%c0_119, %c0_120], %175 {strides = array<i32>} : memref<2x256xf32, #tpu.memory_space<vmem>>, vector<2x256xf32>,
    return
  }
  func.func @transform_0(%arg0: i32) -> (i32, i32) {
    %c0_i32 = arith.constant 0 : i32
    %c0_i32_0 = arith.constant 0 : i32
    return %c0_i32, %arg0 : i32, i32
  }
  func.func @transform_1(%arg0: i32) -> (i32, i32) {
    %c0_i32 = arith.constant 0 : i32
    %c0_i32_0 = arith.constant 0 : i32
    %c0_i32_1 = arith.constant 0 : i32
    return %c0_i32, %c0_i32_0 : i32, i32
  }
  func.func @transform_2(%arg0: i32) -> (i32, i32) {
    %c0_i32 = arith.constant 0 : i32
    %c0_i32_0 = arith.constant 0 : i32
    %c0_i32_1 = arith.constant 0 : i32
    return %c0_i32, %c0_i32_0 : i32, i32
  }
  func.func @transform_3(%arg0: i32) -> (i32, i32, i32) {
    %c0_i32 = arith.constant 0 : i32
    %c0_i32_0 = arith.constant 0 : i32
    %c0_i32_1 = arith.constant 0 : i32
    %c0_i32_2 = arith.constant 0 : i32
    return %c0_i32, %c0_i32_0, %c0_i32_1 : i32, i32, i32
  }
  func.func @transform_4(%arg0: i32) -> (i32, i32, i32) {
    %c0_i32 = arith.constant 0 : i32
    %c0_i32_0 = arith.constant 0 : i32
    %c0_i32_1 = arith.constant 0 : i32
    %c0_i32_2 = arith.constant 0 : i32
    return %c0_i32, %c0_i32_0, %c0_i32_1 : i32, i32, i32
  }
  func.func @transform_5(%arg0: i32) -> (i32, i32) {
    %c0_i32 = arith.constant 0 : i32
    %c0_i32_0 = arith.constant 0 : i32
    return %c0_i32, %arg0 : i32, i32
  }
}

</mosaic_0001>

<bundles_post_ra>
// kernel: net_forward_pallas.1
= control target key start
LH: loop header
LB: loop body
LE: loop exit
PB: predicated region body
PF: predicated region fallthrough
CT: control target
= control target key end

     0   :  { %v2152_v0 = vmov 0   ;;  %vm71_vm0 = vcmask 130048   ;;  %vm186_vm1 = vcmask 261120   ;;  %s2558_s2 = inlined_call_operand.vmem [shape: f32[32,1], index: 2, kind: input, shape index: {}]   ;;  %s2559_s0 = inlined_call_operand.vmem [shape: bf16[16,256], index: 0, kind: input, shape index: {}]   ;;  %s2560_s1 = inlined_call_operand.vmem [shape: bf16[32,16], index: 1, kind: input, shape index: {}]   ;;  %s2561_s4 = inlined_call_operand.vmem [shape: f32[16,32,1], index: 4, kind: input, shape index: {}]   ;;  %s2562_s3 = inlined_call_operand.vmem [shape: bf16[16,32,32], index: 3, kind: input, shape index: {}]   ;;  %s2563_s5 = inlined_call_operand.vmem [shape: f32[2,256], index: 5, kind: output, shape index: {}]  }
   0x1   :  { %2114 = vset.pattern.permute.xlu1 %v2152_v0  ;;  %2113 = vset.pattern.permute.xlu0 %v2152_v0  ;;  %v29_v1 = vld [vmem:[%s2558_s2 + $0x10] sm:$0xff]  ;;  %v27_v2 = vld [vmem:[%s2558_s2] sm:$0xff]  ;;  %v30_v5 = vld [vmem:[%s2558_s2 + $0x18] sm:$0xff] }
   0x2   :  { %43 = vperm.xlu1 %2114, %v29_v1   ;;  %33 = vperm.xlu0 %2113, %v27_v2   ;;  %v2115_v3 = vld [vmem:[%s2559_s0 + $0x4] ss:$8 sps:$4 sm:$0xff]   ;;  %v2117_v4 = vld [vmem:[%s2559_s0] ss:$8 sps:$4 sm:$0xff]   ;;  %v155_v11 = vld [vmem:[%s2561_s4 + $0x18] sm:$0xff] }
   0x3   :  { %v28_v6 = vld [vmem:[%s2558_s2 + $0x8] sm:$0xff]  ;;  %110 = vmatprep.mubr.bf16.mxu0 %v2152_v0  ;;  %120 = vmatprep.mubr.bf16.mxu1 %v2152_v0  ;;  %v2118_v7 = vld [vmem:[%s2560_s1] sm:$0xff]   ;;  %v154_v12 = vld [vmem:[%s2561_s4 + $0x10] sm:$0xff] }
   0x4   :  { %78 = vmatprep.subr.bf16.mxu0 %v2115_v3  ;;  %2109 = vmatprep.subr.bf16.mxu1 %v2115_v3  ;;  %v2119_v8 = vld [vmem:[%s2560_s1 + $0x8] sm:$0xff]   ;;  %v152_v10 = vld [vmem:[%s2561_s4] sm:$0xff]  ;;  %v1935_v15 = vld [vmem:[%s2561_s4 + $0x38] sm:$0xff] }
   0x5   :  { %79 = vmatpush1.bf16.msra.mxu0 %v2117_v4  ;;  %2110 = vmatpush1.bf16.msra.mxu1 %v2117_v4  ;;  %v153_v9 = vld [vmem:[%s2561_s4 + $0x8] sm:$0xff]  ;;  %v1932_v14 = vld [vmem:[%s2561_s4 + $0x20] sm:$0xff]  ;;  %v1934_v16 = vld [vmem:[%s2561_s4 + $0x30] sm:$0xff] }
   0x6   :  { %48 = vperm.xlu1 %2114, %v30_v5   ;;  %38 = vperm.xlu0 %2113, %v28_v6   ;;  %v1933_v13 = vld [vmem:[%s2561_s4 + $0x28] sm:$0xff]  ;;  %v1944_v18 = vld [vmem:[%s2561_s4 + $0x40] sm:$0xff]  ;;  %v1947_v19 = vld [vmem:[%s2561_s4 + $0x58] sm:$0xff] }
   0x7   :  { %v1945_v17 = vld [vmem:[%s2561_s4 + $0x48] sm:$0xff]  ;;  %v1946_v20 = vld [vmem:[%s2561_s4 + $0x50] sm:$0xff]  ;;  %v1956_v22 = vld [vmem:[%s2561_s4 + $0x60] sm:$0xff] }
   0x8   :  { %1922 = vmatmul.mubr.msk.bf16.vlgmr.msra.gmra.mrb[0].mxu0 %vm71_vm0, %v2118_v7  ;;  %1923 = vmatmul.mubr.msk.bf16.vlgmr.msra.gmra.mrb[0].mxu1 %vm71_vm0, %v2119_v8  ;;  %v1957_v21 = vld [vmem:[%s2561_s4 + $0x68] sm:$0xff]  ;;  %v1959_v23 = vld [vmem:[%s2561_s4 + $0x78] sm:$0xff]  ;;  %v1958_v24 = vld [vmem:[%s2561_s4 + $0x70] sm:$0xff] }
   0x9   :  { %225 = vmatprep.mubr.bf16.mxu1 %v2152_v0  ;;  %336 = vmatprep.mubr.bf16.mxu0 %v2152_v0  ;;  %v1969_v25 = vld [vmem:[%s2561_s4 + $0x88] sm:$0xff]  ;;  %v1968_v26 = vld [vmem:[%s2561_s4 + $0x80] sm:$0xff]  ;;  %v1971_v27 = vld [vmem:[%s2561_s4 + $0x98] sm:$0xff] }
   0xa   :  { %163 = vperm.xlu1 %2114, %v153_v9   ;;  %158 = vperm.xlu0 %2113, %v152_v10   ;;  %v1970_v28 = vld [vmem:[%s2561_s4 + $0x90] sm:$0xff]  ;;  %v1981_v29 = vld [vmem:[%s2561_s4 + $0xa8] sm:$0xff]  ;;  %v1980_v30 = vld [vmem:[%s2561_s4 + $0xa0] sm:$0xff] }
   0xb   :  { %v1983_v31 = vld [vmem:[%s2561_s4 + $0xb8] sm:$0xff]  ;;  %v1982_v32 = vld [vmem:[%s2561_s4 + $0xb0] sm:$0xff]  ;;  %v1993_v33 = vld [vmem:[%s2561_s4 + $0xc8] sm:$0xff] }
   0xc   :  { %v1992_v34 = vld [vmem:[%s2561_s4 + $0xc0] sm:$0xff]  ;;  %v1995_v35 = vld [vmem:[%s2561_s4 + $0xd8] sm:$0xff]  ;;  %v1994_v36 = vld [vmem:[%s2561_s4 + $0xd0] sm:$0xff] }
   0xd   :  { %v2005_v37 = vld [vmem:[%s2561_s4 + $0xe8] sm:$0xff]  ;;  %v2004_v38 = vld [vmem:[%s2561_s4 + $0xe0] sm:$0xff]  ;;  %v2007_v39 = vld [vmem:[%s2561_s4 + $0xf8] sm:$0xff] }
   0xe   :  { %173 = vperm.xlu1 %2114, %v155_v11   ;;  %168 = vperm.xlu0 %2113, %v154_v12   ;;  %v2006_v40 = vld [vmem:[%s2561_s4 + $0xf0] sm:$0xff]  ;;  %v2017_v41 = vld [vmem:[%s2561_s4 + $0x108] sm:$0xff]  ;;  %v2016_v42 = vld [vmem:[%s2561_s4 + $0x100] sm:$0xff] }
   0xf   :  { %v2019_v43 = vld [vmem:[%s2561_s4 + $0x118] sm:$0xff]  ;;  %v2018_v44 = vld [vmem:[%s2561_s4 + $0x110] sm:$0xff]  ;;  %v2029_v45 = vld [vmem:[%s2561_s4 + $0x128] sm:$0xff] }
  0x10   :  { %v2028_v46 = vld [vmem:[%s2561_s4 + $0x120] sm:$0xff]  ;;  %v2031_v47 = vld [vmem:[%s2561_s4 + $0x138] sm:$0xff]  ;;  %v2030_v48 = vld [vmem:[%s2561_s4 + $0x130] sm:$0xff] }
  0x11   :  { %v2041_v49 = vld [vmem:[%s2561_s4 + $0x148] sm:$0xff]  ;;  %v2040_v50 = vld [vmem:[%s2561_s4 + $0x140] sm:$0xff]  ;;  %v2043_v51 = vld [vmem:[%s2561_s4 + $0x158] sm:$0xff] }
  0x12   :  { %275 = vperm.xlu1 %2114, %v1933_v13   ;;  %270 = vperm.xlu0 %2113, %v1932_v14   ;;  %v2042_v52 = vld [vmem:[%s2561_s4 + $0x150] sm:$0xff]  ;;  %v2053_v53 = vld [vmem:[%s2561_s4 + $0x168] sm:$0xff]  ;;  %v2052_v54 = vld [vmem:[%s2561_s4 + $0x160] sm:$0xff] }
  0x13   :  { %v2055_v55 = vld [vmem:[%s2561_s4 + $0x178] sm:$0xff]  ;;  %v2054_v56 = vld [vmem:[%s2561_s4 + $0x170] sm:$0xff]  ;;  %v2065_v57 = vld [vmem:[%s2561_s4 + $0x188] sm:$0xff] }
  0x14   :  { %v2064_v58 = vld [vmem:[%s2561_s4 + $0x180] sm:$0xff]  ;;  %v2067_v59 = vld [vmem:[%s2561_s4 + $0x198] sm:$0xff]  ;;  %v2066_v60 = vld [vmem:[%s2561_s4 + $0x190] sm:$0xff] }
  0x15   :  { %v2077_v61 = vld [vmem:[%s2561_s4 + $0x1a8] sm:$0xff]  ;;  %v2076_v62 = vld [vmem:[%s2561_s4 + $0x1a0] sm:$0xff]  ;;  %v2079_v63 = vld [vmem:[%s2561_s4 + $0x1b8] sm:$0xff] }
  0x16   :  { %285 = vperm.xlu1 %2114, %v1935_v15   ;;  %280 = vperm.xlu0 %2113, %v1934_v16   ;;  %v2078_v1 = vld [vmem:[%s2561_s4 + $0x1b0] sm:$0xff]  ;;  %v2089_v2 = vld [vmem:[%s2561_s4 + $0x1c8] sm:$0xff]  ;;  %v2088_v3 = vld [vmem:[%s2561_s4 + $0x1c0] sm:$0xff] }
  0x17   :  { %v2091_v4 = vld [vmem:[%s2561_s4 + $0x1d8] sm:$0xff]  ;;  %v2090_v5 = vld [vmem:[%s2561_s4 + $0x1d0] sm:$0xff]  ;;  %v2100_v6 = vld [vmem:[%s2561_s4 + $0x1e0] sm:$0xff] }
  0x1a   :  { %386 = vperm.xlu1 %2114, %v1945_v17   ;;  %381 = vperm.xlu0 %2113, %v1944_v18  }
  0x1e   :  { %396 = vperm.xlu1 %2114, %v1947_v19   ;;  %391 = vperm.xlu0 %2113, %v1946_v20  }
  0x22   :  { %497 = vperm.xlu1 %2114, %v1957_v21   ;;  %492 = vperm.xlu0 %2113, %v1956_v22  }
  0x26   :  { %507 = vperm.xlu1 %2114, %v1959_v23   ;;  %502 = vperm.xlu0 %2113, %v1958_v24  }
  0x2a   :  { %608 = vperm.xlu1 %2114, %v1969_v25   ;;  %603 = vperm.xlu0 %2113, %v1968_v26  }
  0x2e   :  { %618 = vperm.xlu1 %2114, %v1971_v27   ;;  %613 = vperm.xlu0 %2113, %v1970_v28  }
  0x32   :  { %719 = vperm.xlu1 %2114, %v1981_v29   ;;  %714 = vperm.xlu0 %2113, %v1980_v30  }
  0x36   :  { %729 = vperm.xlu1 %2114, %v1983_v31   ;;  %724 = vperm.xlu0 %2113, %v1982_v32  }
  0x3a   :  { %830 = vperm.xlu1 %2114, %v1993_v33   ;;  %825 = vperm.xlu0 %2113, %v1992_v34  }
  0x3e   :  { %840 = vperm.xlu1 %2114, %v1995_v35   ;;  %835 = vperm.xlu0 %2113, %v1994_v36  }
  0x42   :  { %941 = vperm.xlu1 %2114, %v2005_v37   ;;  %936 = vperm.xlu0 %2113, %v2004_v38  }
  0x46   :  { %951 = vperm.xlu1 %2114, %v2007_v39   ;;  %946 = vperm.xlu0 %2113, %v2006_v40  }
  0x4a   :  { %1052 = vperm.xlu1 %2114, %v2017_v41   ;;  %1047 = vperm.xlu0 %2113, %v2016_v42   ;;  %v2153_v41 = vmov 0.0  }
  0x4e   :  { %1062 = vperm.xlu1 %2114, %v2019_v43   ;;  %1057 = vperm.xlu0 %2113, %v2018_v44   ;;  %v2120_v44 = vld [vmem:[%s2562_s3] sm:$0xff]  }
  0x52   :  { %1163 = vperm.xlu1 %2114, %v2029_v45   ;;  %1158 = vperm.xlu0 %2113, %v2028_v46   ;;  %v2121_v45 = vld [vmem:[%s2562_s3 + $0x8] sm:$0xff]  }
  0x56   :  { %1173 = vperm.xlu1 %2114, %v2031_v47   ;;  %1168 = vperm.xlu0 %2113, %v2030_v48  }
  0x5a   :  { %1274 = vperm.xlu1 %2114, %v2041_v49   ;;  %1269 = vperm.xlu0 %2113, %v2040_v50  }
  0x5e   :  { %1284 = vperm.xlu1 %2114, %v2043_v51   ;;  %1279 = vperm.xlu0 %2113, %v2042_v52  }
  0x62   :  { %1385 = vperm.xlu1 %2114, %v2053_v53   ;;  %1380 = vperm.xlu0 %2113, %v2052_v54  }
  0x66   :  { %1395 = vperm.xlu1 %2114, %v2055_v55   ;;  %1390 = vperm.xlu0 %2113, %v2054_v56  }
  0x6a   :  { %1496 = vperm.xlu1 %2114, %v2065_v57   ;;  %1491 = vperm.xlu0 %2113, %v2064_v58  }
  0x6e   :  { %1506 = vperm.xlu1 %2114, %v2067_v59   ;;  %1501 = vperm.xlu0 %2113, %v2066_v60  }
  0x72   :  { %1607 = vperm.xlu1 %2114, %v2077_v61   ;;  %1602 = vperm.xlu0 %2113, %v2076_v62  }
  0x76   :  { %1617 = vperm.xlu1 %2114, %v2079_v63   ;;  %1612 = vperm.xlu0 %2113, %v2078_v1  }
  0x7a   :  { %1718 = vperm.xlu1 %2114, %v2089_v2   ;;  %1713 = vperm.xlu0 %2113, %v2088_v3  }
  0x7e   :  { %1728 = vperm.xlu1 %2114, %v2091_v4   ;;  %1723 = vperm.xlu0 %2113, %v2090_v5  }
  0x81   :  { %v44_v7 = vpop.permute.xlu1 %43  ;;  %v34_v8 = vpop.permute.xlu0 %33 }
  0x82   :  { %1824 = vperm.xlu0 %2113, %v2100_v6  }
  0x85   :  { %v49_v13 = vpop.permute.xlu1 %48  ;;  %v39_v14 = vpop.permute.xlu0 %38 }
  0x89   :  { %v159_v46 = vpop.permute.xlu0 %158  ;;  %v164_v50 = vpop.permute.xlu1 %163 }
  0x8d   :  { %v169_v61 = vpop.permute.xlu0 %168  ;;  %v174_v3 = vpop.permute.xlu1 %173 }
  0xdb   :  { %v112_v9 = vpop.f32.mrb[0].mxu0  ;;  %v122_v10 = vpop.f32.mrb[0].mxu1 }
  0xdc   :  { %v114_v11 = vpop.f32.mrb[1].mxu0  ;;  %v124_v12 = vpop.f32.mrb[1].mxu1  ;;  %v113_v15 = vadd.f32 %v112_v9, %v34_v8  ;;  %v123_v16 = vadd.f32 %v122_v10, %v44_v7 }
  0xdd   :  { %v115_v17 = vadd.f32 %v114_v11, %v34_v8  ;;  %v125_v18 = vadd.f32 %v124_v12, %v44_v7  ;;  %v116_v19 = vpop.f32.mrb[2].mxu0  ;;  %v126_v20 = vpop.f32.mrb[2].mxu1 }
  0xde   :  { %v117_v21 = vadd.f32 %v116_v19, %v39_v14  ;;  %v127_v22 = vadd.f32 %v126_v20, %v49_v13  ;;  %v118_v23 = vpop.f32.mrb[3].mxu0  ;;  %v128_v24 = vpop.f32.mrb[3].mxu1  ;;  %v131_v27 = vmax.f32 %v113_v15, 0.0  ;;  %v135_v28 = vmax.f32 %v123_v16, 0.0  ;;  %v2122_v15 = vld [vmem:[%s2562_s3 + $0x10] sm:$0xff]   ;;  %v2123_v16 = vld [vmem:[%s2562_s3 + $0x18] sm:$0xff]  }
  0xdf   :  { %v119_v25 = vadd.f32 %v118_v23, %v39_v14  ;;  %v129_v26 = vadd.f32 %v128_v24, %v49_v13  ;;  %v132_v31 = vmax.f32 %v115_v17, 0.0  ;;  %v136_v32 = vmax.f32 %v125_v18, 0.0  ;;  %v271_v17 = vpop.permute.xlu0 %270 }
  0xe0   :  { %v133_v29 = vmax.f32 %v117_v21, 0.0  ;;  %v137_v30 = vmax.f32 %v127_v22, 0.0  ;;  %v276_v21 = vpop.permute.xlu1 %275 }
  0xe1   :  { %v134_v33 = vmax.f32 %v119_v25, 0.0  ;;  %v138_v34 = vmax.f32 %v129_v26, 0.0 }
  0xe2   :  { %v139_v35 = vmax.f32 %v131_v27, %v133_v29  ;;  %v141_v36 = vmax.f32 %v135_v28, %v137_v30 }
  0xe3   :  { %v140_v37 = vmax.f32 %v132_v31, %v134_v33  ;;  %v142_v38 = vmax.f32 %v136_v32, %v138_v34  ;;  %v281_v32 = vpop.permute.xlu0 %280 }
  0xe4   :  { %v143_v39 = vmax.f32 %v139_v35, %v141_v36 }
  0xe5   :  { %v144_v40 = vmax.f32 %v140_v37, %v142_v38  ;;  %v286_v37 = vpop.permute.xlu1 %285 }
  0xe6   :  { %v149_v43 = vpack.c.bf16 %v2153_v41, %v143_v39 }
  0xe7   :  { %v150_v42 = vpack.c.bf16 %v2153_v41, %v144_v40 }
  0xe9   :  { %193 = vmatprep.subr.bf16.mxu1 %v150_v42 }
  0xea   :  { %194 = vmatpush1.bf16.msra.mxu1 %v149_v43 }
  0xed   :  { %1926 = vmatmul.mubr.msk.bf16.vlgmr.msra.gmra.mrb[4].mxu1 %vm186_vm1, %v2120_v44 }
  0xee   :  { %235 = vmatprep.mubr.bf16.mxu1 %v2152_v0 }
  0xf5   :  { %1927 = vmatmul.mubr.msk.bf16.gmra.mrb[8].mxu1 %vm186_vm1, %v2121_v45 }
  0xf6   :  { %447 = vmatprep.mubr.bf16.mxu1 %v2152_v0 }
 0x1c0   :  { %v227_v47 = vpop.f32.mrb[4].mxu1 }
 0x1c1   :  { %v228_v48 = vadd.f32 %v227_v47, %v159_v46  ;;  %v229_v49 = vpop.f32.mrb[5].mxu1 }
 0x1c2   :  { %v230_v51 = vadd.f32 %v229_v49, %v159_v46  ;;  %v231_v52 = vpop.f32.mrb[6].mxu1  ;;  %v2124_v49 = vld [vmem:[%s2562_s3 + $0x20] sm:$0xff]  }
 0x1c3   :  { %v232_v53 = vadd.f32 %v231_v52, %v164_v50  ;;  %v233_v54 = vpop.f32.mrb[7].mxu1  ;;  %v246_v56 = vmax.f32 %v228_v48, 0.0 }
 0x1c4   :  { %v234_v55 = vadd.f32 %v233_v54, %v164_v50  ;;  %v247_v58 = vmax.f32 %v230_v51, 0.0  ;;  %v2125_v50 = vld [vmem:[%s2562_s3 + $0x28] sm:$0xff]   ;;  %v382_v51 = vpop.permute.xlu0 %381 }
 0x1c5   :  { %v248_v57 = vmax.f32 %v232_v53, 0.0 }
 0x1c6   :  { %v249_v59 = vmax.f32 %v234_v55, 0.0  ;;  %v387_v55 = vpop.permute.xlu1 %386 }
 0x1c7   :  { %v259_v60 = vpack.c.bf16 %v248_v57, %v246_v56 }
 0x1c8   :  { %v260_v62 = vpack.c.bf16 %v249_v59, %v247_v58  ;;  %v237_v63 = vpop.f32.mrb[8].mxu1 }
 0x1c9   :  { %v238_v1 = vadd.f32 %v237_v63, %v169_v61  ;;  %v239_v2 = vpop.f32.mrb[9].mxu1 }
 0x1ca   :  { %v240_v4 = vadd.f32 %v239_v2, %v169_v61  ;;  %v241_v5 = vpop.f32.mrb[10].mxu1  ;;  %304 = vmatprep.subr.bf16.mxu0 %v260_v62 }
 0x1cb   :  { %v242_v6 = vadd.f32 %v241_v5, %v174_v3  ;;  %v243_v7 = vpop.f32.mrb[11].mxu1  ;;  %305 = vmatpush1.bf16.msra.mxu0 %v259_v60  ;;  %v250_v9 = vmax.f32 %v238_v1, 0.0 }
 0x1cc   :  { %v244_v8 = vadd.f32 %v243_v7, %v174_v3  ;;  %v251_v11 = vmax.f32 %v240_v4, 0.0  ;;  %v392_v3 = vpop.permute.xlu0 %391 }
 0x1cd   :  { %v252_v10 = vmax.f32 %v242_v6, 0.0 }
 0x1ce   :  { %v253_v12 = vmax.f32 %v244_v8, 0.0  ;;  %v397_v8 = vpop.permute.xlu1 %396 }
 0x1cf   :  { %v261_v13 = vpack.c.bf16 %v252_v10, %v250_v9 }
 0x1d0   :  { %v262_v14 = vpack.c.bf16 %v253_v12, %v251_v11 }
 0x1d2   :  { %306 = vmatprep.subr.bf16.mxu0 %v262_v14 }
 0x1d3   :  { %307 = vmatpush1.bf16.msra.mxu0 %v261_v13 }
 0x1d6   :  { %1938 = vmatmul.mubr.msk.bf16.vlgmr.msra.gmra.mrb[4].mxu0 %vm186_vm1, %v2122_v15 }
 0x1d7   :  { %346 = vmatprep.mubr.bf16.mxu0 %v2152_v0 }
 0x1de   :  { %1939 = vmatmul.mubr.msk.bf16.gmra.mrb[8].mxu0 %vm186_vm1, %v2123_v16 }
 0x1df   :  { %558 = vmatprep.mubr.bf16.mxu0 %v2152_v0 }
 0x2a9   :  { %v338_v18 = vpop.f32.mrb[4].mxu0 }
 0x2aa   :  { %v339_v19 = vadd.f32 %v338_v18, %v271_v17  ;;  %v340_v20 = vpop.f32.mrb[5].mxu0 }
 0x2ab   :  { %v341_v22 = vadd.f32 %v340_v20, %v271_v17  ;;  %v342_v23 = vpop.f32.mrb[6].mxu0  ;;  %v2126_v20 = vld [vmem:[%s2562_s3 + $0x30] sm:$0xff]  }
 0x2ac   :  { %v343_v24 = vadd.f32 %v342_v23, %v276_v21  ;;  %v344_v25 = vpop.f32.mrb[7].mxu0  ;;  %v357_v27 = vmax.f32 %v339_v19, 0.0 }
 0x2ad   :  { %v345_v26 = vadd.f32 %v344_v25, %v276_v21  ;;  %v358_v29 = vmax.f32 %v341_v22, 0.0  ;;  %v2127_v21 = vld [vmem:[%s2562_s3 + $0x38] sm:$0xff]   ;;  %v493_v22 = vpop.permute.xlu0 %492 }
 0x2ae   :  { %v359_v28 = vmax.f32 %v343_v24, 0.0 }
 0x2af   :  { %v360_v30 = vmax.f32 %v345_v26, 0.0  ;;  %v498_v26 = vpop.permute.xlu1 %497 }
 0x2b0   :  { %v370_v31 = vpack.c.bf16 %v359_v28, %v357_v27 }
 0x2b1   :  { %v371_v33 = vpack.c.bf16 %v360_v30, %v358_v29  ;;  %v348_v34 = vpop.f32.mrb[8].mxu0 }
 0x2b2   :  { %v349_v35 = vadd.f32 %v348_v34, %v281_v32  ;;  %v350_v36 = vpop.f32.mrb[9].mxu0 }
 0x2b3   :  { %v351_v38 = vadd.f32 %v350_v36, %v281_v32  ;;  %v352_v39 = vpop.f32.mrb[10].mxu0  ;;  %415 = vmatprep.subr.bf16.mxu1 %v371_v33 }
 0x2b4   :  { %v353_v40 = vadd.f32 %v352_v39, %v286_v37  ;;  %v354_v41 = vpop.f32.mrb[11].mxu0  ;;  %416 = vmatpush1.bf16.msra.mxu1 %v370_v31  ;;  %v361_v43 = vmax.f32 %v349_v35, 0.0 }
 0x2b5   :  { %v355_v42 = vadd.f32 %v354_v41, %v286_v37  ;;  %v362_v45 = vmax.f32 %v351_v38, 0.0  ;;  %v503_v37 = vpop.permute.xlu0 %502 }
 0x2b6   :  { %v363_v44 = vmax.f32 %v353_v40, 0.0 }
 0x2b7   :  { %v364_v46 = vmax.f32 %v355_v42, 0.0  ;;  %v508_v42 = vpop.permute.xlu1 %507 }
 0x2b8   :  { %v372_v47 = vpack.c.bf16 %v363_v44, %v361_v43 }
 0x2b9   :  { %v373_v48 = vpack.c.bf16 %v364_v46, %v362_v45 }
 0x2bb   :  { %417 = vmatprep.subr.bf16.mxu1 %v373_v48 }
 0x2bc   :  { %418 = vmatpush1.bf16.msra.mxu1 %v372_v47 }
 0x2bf   :  { %1950 = vmatmul.mubr.msk.bf16.vlgmr.msra.gmra.mrb[12].mxu1 %vm186_vm1, %v2124_v49 }
 0x2c0   :  { %457 = vmatprep.mubr.bf16.mxu1 %v2152_v0 }
 0x2c7   :  { %1951 = vmatmul.mubr.msk.bf16.gmra.mrb[16].mxu1 %vm186_vm1, %v2125_v50 }
 0x2c8   :  { %669 = vmatprep.mubr.bf16.mxu1 %v2152_v0 }
 0x392   :  { %v449_v52 = vpop.f32.mrb[12].mxu1 }
 0x393   :  { %v450_v53 = vadd.f32 %v449_v52, %v382_v51  ;;  %v451_v54 = vpop.f32.mrb[13].mxu1 }
 0x394   :  { %v452_v56 = vadd.f32 %v451_v54, %v382_v51  ;;  %v453_v57 = vpop.f32.mrb[14].mxu1  ;;  %v2128_v54 = vld [vmem:[%s2562_s3 + $0x40] sm:$0xff]  }
 0x395   :  { %v454_v58 = vadd.f32 %v453_v57, %v387_v55  ;;  %v455_v59 = vpop.f32.mrb[15].mxu1  ;;  %v468_v61 = vmax.f32 %v450_v53, 0.0 }
 0x396   :  { %v456_v60 = vadd.f32 %v455_v59, %v387_v55  ;;  %v469_v63 = vmax.f32 %v452_v56, 0.0  ;;  %v2129_v55 = vld [vmem:[%s2562_s3 + $0x48] sm:$0xff]   ;;  %v604_v56 = vpop.permute.xlu0 %603 }
 0x397   :  { %v470_v62 = vmax.f32 %v454_v58, 0.0 }
 0x398   :  { %v471_v1 = vmax.f32 %v456_v60, 0.0  ;;  %v609_v60 = vpop.permute.xlu1 %608 }
 0x399   :  { %v481_v2 = vpack.c.bf16 %v470_v62, %v468_v61 }
 0x39a   :  { %v482_v4 = vpack.c.bf16 %v471_v1, %v469_v63  ;;  %v459_v5 = vpop.f32.mrb[16].mxu1 }
 0x39b   :  { %v460_v6 = vadd.f32 %v459_v5, %v392_v3  ;;  %v461_v7 = vpop.f32.mrb[17].mxu1 }
 0x39c   :  { %v462_v9 = vadd.f32 %v461_v7, %v392_v3  ;;  %v463_v10 = vpop.f32.mrb[18].mxu1  ;;  %526 = vmatprep.subr.bf16.mxu0 %v482_v4 }
 0x39d   :  { %v464_v11 = vadd.f32 %v463_v10, %v397_v8  ;;  %v465_v12 = vpop.f32.mrb[19].mxu1  ;;  %527 = vmatpush1.bf16.msra.mxu0 %v481_v2  ;;  %v472_v14 = vmax.f32 %v460_v6, 0.0 }
 0x39e   :  { %v466_v13 = vadd.f32 %v465_v12, %v397_v8  ;;  %v473_v16 = vmax.f32 %v462_v9, 0.0  ;;  %v614_v8 = vpop.permute.xlu0 %613 }
 0x39f   :  { %v474_v15 = vmax.f32 %v464_v11, 0.0 }
 0x3a0   :  { %v475_v17 = vmax.f32 %v466_v13, 0.0  ;;  %v619_v13 = vpop.permute.xlu1 %618 }
 0x3a1   :  { %v483_v18 = vpack.c.bf16 %v474_v15, %v472_v14 }
 0x3a2   :  { %v484_v19 = vpack.c.bf16 %v475_v17, %v473_v16 }
 0x3a4   :  { %528 = vmatprep.subr.bf16.mxu0 %v484_v19 }
 0x3a5   :  { %529 = vmatpush1.bf16.msra.mxu0 %v483_v18 }
 0x3a8   :  { %1962 = vmatmul.mubr.msk.bf16.vlgmr.msra.gmra.mrb[12].mxu0 %vm186_vm1, %v2126_v20 }
 0x3a9   :  { %568 = vmatprep.mubr.bf16.mxu0 %v2152_v0 }
 0x3b0   :  { %1963 = vmatmul.mubr.msk.bf16.gmra.mrb[16].mxu0 %vm186_vm1, %v2127_v21 }
 0x3b1   :  { %780 = vmatprep.mubr.bf16.mxu0 %v2152_v0 }
 0x47b   :  { %v560_v23 = vpop.f32.mrb[12].mxu0 }
 0x47c   :  { %v561_v24 = vadd.f32 %v560_v23, %v493_v22  ;;  %v562_v25 = vpop.f32.mrb[13].mxu0 }
 0x47d   :  { %v563_v27 = vadd.f32 %v562_v25, %v493_v22  ;;  %v564_v28 = vpop.f32.mrb[14].mxu0  ;;  %v2130_v25 = vld [vmem:[%s2562_s3 + $0x50] sm:$0xff]  }
 0x47e   :  { %v565_v29 = vadd.f32 %v564_v28, %v498_v26  ;;  %v566_v30 = vpop.f32.mrb[15].mxu0  ;;  %v579_v32 = vmax.f32 %v561_v24, 0.0 }
 0x47f   :  { %v567_v31 = vadd.f32 %v566_v30, %v498_v26  ;;  %v580_v34 = vmax.f32 %v563_v27, 0.0  ;;  %v2131_v26 = vld [vmem:[%s2562_s3 + $0x58] sm:$0xff]   ;;  %v715_v27 = vpop.permute.xlu0 %714 }
 0x480   :  { %v581_v33 = vmax.f32 %v565_v29, 0.0 }
 0x481   :  { %v582_v35 = vmax.f32 %v567_v31, 0.0  ;;  %v720_v31 = vpop.permute.xlu1 %719 }
 0x482   :  { %v592_v36 = vpack.c.bf16 %v581_v33, %v579_v32 }
 0x483   :  { %v593_v38 = vpack.c.bf16 %v582_v35, %v580_v34  ;;  %v570_v39 = vpop.f32.mrb[16].mxu0 }
 0x484   :  { %v571_v40 = vadd.f32 %v570_v39, %v503_v37  ;;  %v572_v41 = vpop.f32.mrb[17].mxu0 }
 0x485   :  { %v573_v43 = vadd.f32 %v572_v41, %v503_v37  ;;  %v574_v44 = vpop.f32.mrb[18].mxu0  ;;  %637 = vmatprep.subr.bf16.mxu1 %v593_v38 }
 0x486   :  { %v575_v45 = vadd.f32 %v574_v44, %v508_v42  ;;  %v576_v46 = vpop.f32.mrb[19].mxu0  ;;  %638 = vmatpush1.bf16.msra.mxu1 %v592_v36  ;;  %v583_v48 = vmax.f32 %v571_v40, 0.0 }
 0x487   :  { %v577_v47 = vadd.f32 %v576_v46, %v508_v42  ;;  %v584_v50 = vmax.f32 %v573_v43, 0.0  ;;  %v725_v42 = vpop.permute.xlu0 %724 }
 0x488   :  { %v585_v49 = vmax.f32 %v575_v45, 0.0 }
 0x489   :  { %v586_v51 = vmax.f32 %v577_v47, 0.0  ;;  %v730_v47 = vpop.permute.xlu1 %729 }
 0x48a   :  { %v594_v52 = vpack.c.bf16 %v585_v49, %v583_v48 }
 0x48b   :  { %v595_v53 = vpack.c.bf16 %v586_v51, %v584_v50 }
 0x48d   :  { %639 = vmatprep.subr.bf16.mxu1 %v595_v53 }
 0x48e   :  { %640 = vmatpush1.bf16.msra.mxu1 %v594_v52 }
 0x491   :  { %1974 = vmatmul.mubr.msk.bf16.vlgmr.msra.gmra.mrb[20].mxu1 %vm186_vm1, %v2128_v54 }
 0x492   :  { %679 = vmatprep.mubr.bf16.mxu1 %v2152_v0 }
 0x499   :  { %1975 = vmatmul.mubr.msk.bf16.gmra.mrb[24].mxu1 %vm186_vm1, %v2129_v55 }
 0x49a   :  { %891 = vmatprep.mubr.bf16.mxu1 %v2152_v0 }
 0x564   :  { %v671_v57 = vpop.f32.mrb[20].mxu1 }
 0x565   :  { %v672_v58 = vadd.f32 %v671_v57, %v604_v56  ;;  %v673_v59 = vpop.f32.mrb[21].mxu1 }
 0x566   :  { %v674_v61 = vadd.f32 %v673_v59, %v604_v56  ;;  %v675_v62 = vpop.f32.mrb[22].mxu1  ;;  %v2132_v59 = vld [vmem:[%s2562_s3 + $0x60] sm:$0xff]  }
 0x567   :  { %v676_v63 = vadd.f32 %v675_v62, %v609_v60  ;;  %v677_v1 = vpop.f32.mrb[23].mxu1  ;;  %v690_v3 = vmax.f32 %v672_v58, 0.0 }
 0x568   :  { %v678_v2 = vadd.f32 %v677_v1, %v609_v60  ;;  %v691_v5 = vmax.f32 %v674_v61, 0.0  ;;  %v2133_v60 = vld [vmem:[%s2562_s3 + $0x68] sm:$0xff]   ;;  %v826_v61 = vpop.permute.xlu0 %825 }
 0x569   :  { %v692_v4 = vmax.f32 %v676_v63, 0.0 }
 0x56a   :  { %v693_v6 = vmax.f32 %v678_v2, 0.0  ;;  %v831_v2 = vpop.permute.xlu1 %830 }
 0x56b   :  { %v703_v7 = vpack.c.bf16 %v692_v4, %v690_v3 }
 0x56c   :  { %v704_v9 = vpack.c.bf16 %v693_v6, %v691_v5  ;;  %v681_v10 = vpop.f32.mrb[24].mxu1 }
 0x56d   :  { %v682_v11 = vadd.f32 %v681_v10, %v614_v8  ;;  %v683_v12 = vpop.f32.mrb[25].mxu1 }
 0x56e   :  { %v684_v14 = vadd.f32 %v683_v12, %v614_v8  ;;  %v685_v15 = vpop.f32.mrb[26].mxu1  ;;  %748 = vmatprep.subr.bf16.mxu0 %v704_v9 }
 0x56f   :  { %v686_v16 = vadd.f32 %v685_v15, %v619_v13  ;;  %v687_v17 = vpop.f32.mrb[27].mxu1  ;;  %749 = vmatpush1.bf16.msra.mxu0 %v703_v7  ;;  %v694_v19 = vmax.f32 %v682_v11, 0.0 }
 0x570   :  { %v688_v18 = vadd.f32 %v687_v17, %v619_v13  ;;  %v695_v21 = vmax.f32 %v684_v14, 0.0  ;;  %v836_v13 = vpop.permute.xlu0 %835 }
 0x571   :  { %v696_v20 = vmax.f32 %v686_v16, 0.0 }
 0x572   :  { %v697_v22 = vmax.f32 %v688_v18, 0.0  ;;  %v841_v18 = vpop.permute.xlu1 %840 }
 0x573   :  { %v705_v23 = vpack.c.bf16 %v696_v20, %v694_v19 }
 0x574   :  { %v706_v24 = vpack.c.bf16 %v697_v22, %v695_v21 }
 0x576   :  { %750 = vmatprep.subr.bf16.mxu0 %v706_v24 }
 0x577   :  { %751 = vmatpush1.bf16.msra.mxu0 %v705_v23 }
 0x57a   :  { %1986 = vmatmul.mubr.msk.bf16.vlgmr.msra.gmra.mrb[20].mxu0 %vm186_vm1, %v2130_v25 }
 0x57b   :  { %790 = vmatprep.mubr.bf16.mxu0 %v2152_v0 }
 0x582   :  { %1987 = vmatmul.mubr.msk.bf16.gmra.mrb[24].mxu0 %vm186_vm1, %v2131_v26 }
 0x583   :  { %1002 = vmatprep.mubr.bf16.mxu0 %v2152_v0 }
 0x64d   :  { %v782_v28 = vpop.f32.mrb[20].mxu0 }
 0x64e   :  { %v783_v29 = vadd.f32 %v782_v28, %v715_v27  ;;  %v784_v30 = vpop.f32.mrb[21].mxu0 }
 0x64f   :  { %v785_v32 = vadd.f32 %v784_v30, %v715_v27  ;;  %v786_v33 = vpop.f32.mrb[22].mxu0  ;;  %v2134_v30 = vld [vmem:[%s2562_s3 + $0x70] sm:$0xff]  }
 0x650   :  { %v787_v34 = vadd.f32 %v786_v33, %v720_v31  ;;  %v788_v35 = vpop.f32.mrb[23].mxu0  ;;  %v801_v37 = vmax.f32 %v783_v29, 0.0 }
 0x651   :  { %v789_v36 = vadd.f32 %v788_v35, %v720_v31  ;;  %v802_v39 = vmax.f32 %v785_v32, 0.0  ;;  %v2135_v31 = vld [vmem:[%s2562_s3 + $0x78] sm:$0xff]   ;;  %v937_v32 = vpop.permute.xlu0 %936 }
 0x652   :  { %v803_v38 = vmax.f32 %v787_v34, 0.0 }
 0x653   :  { %v804_v40 = vmax.f32 %v789_v36, 0.0  ;;  %v942_v36 = vpop.permute.xlu1 %941 }
 0x654   :  { %v814_v41 = vpack.c.bf16 %v803_v38, %v801_v37 }
 0x655   :  { %v815_v43 = vpack.c.bf16 %v804_v40, %v802_v39  ;;  %v792_v44 = vpop.f32.mrb[24].mxu0 }
 0x656   :  { %v793_v45 = vadd.f32 %v792_v44, %v725_v42  ;;  %v794_v46 = vpop.f32.mrb[25].mxu0 }
 0x657   :  { %v795_v48 = vadd.f32 %v794_v46, %v725_v42  ;;  %v796_v49 = vpop.f32.mrb[26].mxu0  ;;  %859 = vmatprep.subr.bf16.mxu1 %v815_v43 }
 0x658   :  { %v797_v50 = vadd.f32 %v796_v49, %v730_v47  ;;  %v798_v51 = vpop.f32.mrb[27].mxu0  ;;  %860 = vmatpush1.bf16.msra.mxu1 %v814_v41  ;;  %v805_v53 = vmax.f32 %v793_v45, 0.0 }
 0x659   :  { %v799_v52 = vadd.f32 %v798_v51, %v730_v47  ;;  %v806_v55 = vmax.f32 %v795_v48, 0.0  ;;  %v947_v47 = vpop.permute.xlu0 %946 }
 0x65a   :  { %v807_v54 = vmax.f32 %v797_v50, 0.0 }
 0x65b   :  { %v808_v56 = vmax.f32 %v799_v52, 0.0  ;;  %v952_v52 = vpop.permute.xlu1 %951 }
 0x65c   :  { %v816_v57 = vpack.c.bf16 %v807_v54, %v805_v53 }
 0x65d   :  { %v817_v58 = vpack.c.bf16 %v808_v56, %v806_v55 }
 0x65f   :  { %861 = vmatprep.subr.bf16.mxu1 %v817_v58 }
 0x660   :  { %862 = vmatpush1.bf16.msra.mxu1 %v816_v57 }
 0x663   :  { %1998 = vmatmul.mubr.msk.bf16.vlgmr.msra.gmra.mrb[28].mxu1 %vm186_vm1, %v2132_v59 }
 0x664   :  { %901 = vmatprep.mubr.bf16.mxu1 %v2152_v0 }
 0x66b   :  { %1999 = vmatmul.mubr.msk.bf16.gmra.mrb[32].mxu1 %vm186_vm1, %v2133_v60 }
 0x66c   :  { %1113 = vmatprep.mubr.bf16.mxu1 %v2152_v0 }
 0x736   :  { %v893_v62 = vpop.f32.mrb[28].mxu1 }
 0x737   :  { %v894_v63 = vadd.f32 %v893_v62, %v826_v61  ;;  %v895_v1 = vpop.f32.mrb[29].mxu1 }
 0x738   :  { %v896_v3 = vadd.f32 %v895_v1, %v826_v61  ;;  %v897_v4 = vpop.f32.mrb[30].mxu1  ;;  %v2136_v1 = vld [vmem:[%s2562_s3 + $0x80] sm:$0xff]  }
 0x739   :  { %v898_v5 = vadd.f32 %v897_v4, %v831_v2  ;;  %v899_v6 = vpop.f32.mrb[31].mxu1  ;;  %v912_v8 = vmax.f32 %v894_v63, 0.0 }
 0x73a   :  { %v900_v7 = vadd.f32 %v899_v6, %v831_v2  ;;  %v913_v10 = vmax.f32 %v896_v3, 0.0  ;;  %v2137_v2 = vld [vmem:[%s2562_s3 + $0x88] sm:$0xff]   ;;  %v1048_v3 = vpop.permute.xlu0 %1047 }
 0x73b   :  { %v914_v9 = vmax.f32 %v898_v5, 0.0 }
 0x73c   :  { %v915_v11 = vmax.f32 %v900_v7, 0.0  ;;  %v1053_v7 = vpop.permute.xlu1 %1052 }
 0x73d   :  { %v925_v12 = vpack.c.bf16 %v914_v9, %v912_v8 }
 0x73e   :  { %v926_v14 = vpack.c.bf16 %v915_v11, %v913_v10  ;;  %v903_v15 = vpop.f32.mrb[32].mxu1 }
 0x73f   :  { %v904_v16 = vadd.f32 %v903_v15, %v836_v13  ;;  %v905_v17 = vpop.f32.mrb[33].mxu1 }
 0x740   :  { %v906_v19 = vadd.f32 %v905_v17, %v836_v13  ;;  %v907_v20 = vpop.f32.mrb[34].mxu1  ;;  %970 = vmatprep.subr.bf16.mxu0 %v926_v14 }
 0x741   :  { %v908_v21 = vadd.f32 %v907_v20, %v841_v18  ;;  %v909_v22 = vpop.f32.mrb[35].mxu1  ;;  %971 = vmatpush1.bf16.msra.mxu0 %v925_v12  ;;  %v916_v24 = vmax.f32 %v904_v16, 0.0 }
 0x742   :  { %v910_v23 = vadd.f32 %v909_v22, %v841_v18  ;;  %v917_v26 = vmax.f32 %v906_v19, 0.0  ;;  %v1058_v18 = vpop.permute.xlu0 %1057 }
 0x743   :  { %v918_v25 = vmax.f32 %v908_v21, 0.0 }
 0x744   :  { %v919_v27 = vmax.f32 %v910_v23, 0.0  ;;  %v1063_v23 = vpop.permute.xlu1 %1062 }
 0x745   :  { %v927_v28 = vpack.c.bf16 %v918_v25, %v916_v24 }
 0x746   :  { %v928_v29 = vpack.c.bf16 %v919_v27, %v917_v26 }
 0x748   :  { %972 = vmatprep.subr.bf16.mxu0 %v928_v29 }
 0x749   :  { %973 = vmatpush1.bf16.msra.mxu0 %v927_v28 }
 0x74c   :  { %2010 = vmatmul.mubr.msk.bf16.vlgmr.msra.gmra.mrb[28].mxu0 %vm186_vm1, %v2134_v30 }
 0x74d   :  { %1012 = vmatprep.mubr.bf16.mxu0 %v2152_v0 }
 0x754   :  { %2011 = vmatmul.mubr.msk.bf16.gmra.mrb[32].mxu0 %vm186_vm1, %v2135_v31 }
 0x755   :  { %1224 = vmatprep.mubr.bf16.mxu0 %v2152_v0 }
 0x81f   :  { %v1004_v33 = vpop.f32.mrb[28].mxu0 }
 0x820   :  { %v1005_v34 = vadd.f32 %v1004_v33, %v937_v32  ;;  %v1006_v35 = vpop.f32.mrb[29].mxu0 }
 0x821   :  { %v1007_v37 = vadd.f32 %v1006_v35, %v937_v32  ;;  %v1008_v38 = vpop.f32.mrb[30].mxu0  ;;  %v2138_v35 = vld [vmem:[%s2562_s3 + $0x90] sm:$0xff]  }
 0x822   :  { %v1009_v39 = vadd.f32 %v1008_v38, %v942_v36  ;;  %v1010_v40 = vpop.f32.mrb[31].mxu0  ;;  %v1023_v42 = vmax.f32 %v1005_v34, 0.0 }
 0x823   :  { %v1011_v41 = vadd.f32 %v1010_v40, %v942_v36  ;;  %v1024_v44 = vmax.f32 %v1007_v37, 0.0  ;;  %v2139_v36 = vld [vmem:[%s2562_s3 + $0x98] sm:$0xff]   ;;  %v1159_v37 = vpop.permute.xlu0 %1158 }
 0x824   :  { %v1025_v43 = vmax.f32 %v1009_v39, 0.0 }
 0x825   :  { %v1026_v45 = vmax.f32 %v1011_v41, 0.0  ;;  %v1164_v41 = vpop.permute.xlu1 %1163 }
 0x826   :  { %v1036_v46 = vpack.c.bf16 %v1025_v43, %v1023_v42 }
 0x827   :  { %v1037_v48 = vpack.c.bf16 %v1026_v45, %v1024_v44  ;;  %v1014_v49 = vpop.f32.mrb[32].mxu0 }
 0x828   :  { %v1015_v50 = vadd.f32 %v1014_v49, %v947_v47  ;;  %v1016_v51 = vpop.f32.mrb[33].mxu0 }
 0x829   :  { %v1017_v53 = vadd.f32 %v1016_v51, %v947_v47  ;;  %v1018_v54 = vpop.f32.mrb[34].mxu0  ;;  %1081 = vmatprep.subr.bf16.mxu1 %v1037_v48 }
 0x82a   :  { %v1019_v55 = vadd.f32 %v1018_v54, %v952_v52  ;;  %v1020_v56 = vpop.f32.mrb[35].mxu0  ;;  %1082 = vmatpush1.bf16.msra.mxu1 %v1036_v46  ;;  %v1027_v58 = vmax.f32 %v1015_v50, 0.0 }
 0x82b   :  { %v1021_v57 = vadd.f32 %v1020_v56, %v952_v52  ;;  %v1028_v60 = vmax.f32 %v1017_v53, 0.0  ;;  %v1169_v52 = vpop.permute.xlu0 %1168 }
 0x82c   :  { %v1029_v59 = vmax.f32 %v1019_v55, 0.0 }
 0x82d   :  { %v1030_v61 = vmax.f32 %v1021_v57, 0.0  ;;  %v1174_v57 = vpop.permute.xlu1 %1173 }
 0x82e   :  { %v1038_v62 = vpack.c.bf16 %v1029_v59, %v1027_v58 }
 0x82f   :  { %v1039_v63 = vpack.c.bf16 %v1030_v61, %v1028_v60 }
 0x831   :  { %1083 = vmatprep.subr.bf16.mxu1 %v1039_v63 }
 0x832   :  { %1084 = vmatpush1.bf16.msra.mxu1 %v1038_v62 }
 0x835   :  { %2022 = vmatmul.mubr.msk.bf16.vlgmr.msra.gmra.mrb[36].mxu1 %vm186_vm1, %v2136_v1 }
 0x836   :  { %1123 = vmatprep.mubr.bf16.mxu1 %v2152_v0 }
 0x83d   :  { %2023 = vmatmul.mubr.msk.bf16.gmra.mrb[40].mxu1 %vm186_vm1, %v2137_v2 }
 0x83e   :  { %1335 = vmatprep.mubr.bf16.mxu1 %v2152_v0 }
 0x908   :  { %v1115_v4 = vpop.f32.mrb[36].mxu1 }
 0x909   :  { %v1116_v5 = vadd.f32 %v1115_v4, %v1048_v3  ;;  %v1117_v6 = vpop.f32.mrb[37].mxu1 }
 0x90a   :  { %v1118_v8 = vadd.f32 %v1117_v6, %v1048_v3  ;;  %v1119_v9 = vpop.f32.mrb[38].mxu1  ;;  %v2140_v6 = vld [vmem:[%s2562_s3 + $0xa0] sm:$0xff]  }
 0x90b   :  { %v1120_v10 = vadd.f32 %v1119_v9, %v1053_v7  ;;  %v1121_v11 = vpop.f32.mrb[39].mxu1  ;;  %v1134_v13 = vmax.f32 %v1116_v5, 0.0 }
 0x90c   :  { %v1122_v12 = vadd.f32 %v1121_v11, %v1053_v7  ;;  %v1135_v15 = vmax.f32 %v1118_v8, 0.0  ;;  %v2141_v7 = vld [vmem:[%s2562_s3 + $0xa8] sm:$0xff]   ;;  %v1270_v8 = vpop.permute.xlu0 %1269 }
 0x90d   :  { %v1136_v14 = vmax.f32 %v1120_v10, 0.0 }
 0x90e   :  { %v1137_v16 = vmax.f32 %v1122_v12, 0.0  ;;  %v1275_v12 = vpop.permute.xlu1 %1274 }
 0x90f   :  { %v1147_v17 = vpack.c.bf16 %v1136_v14, %v1134_v13 }
 0x910   :  { %v1148_v19 = vpack.c.bf16 %v1137_v16, %v1135_v15  ;;  %v1125_v20 = vpop.f32.mrb[40].mxu1 }
 0x911   :  { %v1126_v21 = vadd.f32 %v1125_v20, %v1058_v18  ;;  %v1127_v22 = vpop.f32.mrb[41].mxu1 }
 0x912   :  { %v1128_v24 = vadd.f32 %v1127_v22, %v1058_v18  ;;  %v1129_v25 = vpop.f32.mrb[42].mxu1  ;;  %1192 = vmatprep.subr.bf16.mxu0 %v1148_v19 }
 0x913   :  { %v1130_v26 = vadd.f32 %v1129_v25, %v1063_v23  ;;  %v1131_v27 = vpop.f32.mrb[43].mxu1  ;;  %1193 = vmatpush1.bf16.msra.mxu0 %v1147_v17  ;;  %v1138_v29 = vmax.f32 %v1126_v21, 0.0 }
 0x914   :  { %v1132_v28 = vadd.f32 %v1131_v27, %v1063_v23  ;;  %v1139_v31 = vmax.f32 %v1128_v24, 0.0  ;;  %v1280_v23 = vpop.permute.xlu0 %1279 }
 0x915   :  { %v1140_v30 = vmax.f32 %v1130_v26, 0.0 }
 0x916   :  { %v1141_v32 = vmax.f32 %v1132_v28, 0.0  ;;  %v1285_v28 = vpop.permute.xlu1 %1284 }
 0x917   :  { %v1149_v33 = vpack.c.bf16 %v1140_v30, %v1138_v29 }
 0x918   :  { %v1150_v34 = vpack.c.bf16 %v1141_v32, %v1139_v31 }
 0x91a   :  { %1194 = vmatprep.subr.bf16.mxu0 %v1150_v34 }
 0x91b   :  { %1195 = vmatpush1.bf16.msra.mxu0 %v1149_v33 }
 0x91e   :  { %2034 = vmatmul.mubr.msk.bf16.vlgmr.msra.gmra.mrb[36].mxu0 %vm186_vm1, %v2138_v35 }
 0x91f   :  { %1234 = vmatprep.mubr.bf16.mxu0 %v2152_v0 }
 0x926   :  { %2035 = vmatmul.mubr.msk.bf16.gmra.mrb[40].mxu0 %vm186_vm1, %v2139_v36 }
 0x927   :  { %1446 = vmatprep.mubr.bf16.mxu0 %v2152_v0 }
 0x9f1   :  { %v1226_v38 = vpop.f32.mrb[36].mxu0 }
 0x9f2   :  { %v1227_v39 = vadd.f32 %v1226_v38, %v1159_v37  ;;  %v1228_v40 = vpop.f32.mrb[37].mxu0 }
 0x9f3   :  { %v1229_v42 = vadd.f32 %v1228_v40, %v1159_v37  ;;  %v1230_v43 = vpop.f32.mrb[38].mxu0  ;;  %v2142_v40 = vld [vmem:[%s2562_s3 + $0xb0] sm:$0xff]  }
 0x9f4   :  { %v1231_v44 = vadd.f32 %v1230_v43, %v1164_v41  ;;  %v1232_v45 = vpop.f32.mrb[39].mxu0  ;;  %v1245_v47 = vmax.f32 %v1227_v39, 0.0 }
 0x9f5   :  { %v1233_v46 = vadd.f32 %v1232_v45, %v1164_v41  ;;  %v1246_v49 = vmax.f32 %v1229_v42, 0.0  ;;  %v2143_v41 = vld [vmem:[%s2562_s3 + $0xb8] sm:$0xff]   ;;  %v1381_v42 = vpop.permute.xlu0 %1380 }
 0x9f6   :  { %v1247_v48 = vmax.f32 %v1231_v44, 0.0 }
 0x9f7   :  { %v1248_v50 = vmax.f32 %v1233_v46, 0.0  ;;  %v1386_v46 = vpop.permute.xlu1 %1385 }
 0x9f8   :  { %v1258_v51 = vpack.c.bf16 %v1247_v48, %v1245_v47 }
 0x9f9   :  { %v1259_v53 = vpack.c.bf16 %v1248_v50, %v1246_v49  ;;  %v1236_v54 = vpop.f32.mrb[40].mxu0 }
 0x9fa   :  { %v1237_v55 = vadd.f32 %v1236_v54, %v1169_v52  ;;  %v1238_v56 = vpop.f32.mrb[41].mxu0 }
 0x9fb   :  { %v1239_v58 = vadd.f32 %v1238_v56, %v1169_v52  ;;  %v1240_v59 = vpop.f32.mrb[42].mxu0  ;;  %1303 = vmatprep.subr.bf16.mxu1 %v1259_v53 }
 0x9fc   :  { %v1241_v60 = vadd.f32 %v1240_v59, %v1174_v57  ;;  %v1242_v61 = vpop.f32.mrb[43].mxu0  ;;  %1304 = vmatpush1.bf16.msra.mxu1 %v1258_v51  ;;  %v1249_v63 = vmax.f32 %v1237_v55, 0.0 }
 0x9fd   :  { %v1243_v62 = vadd.f32 %v1242_v61, %v1174_v57  ;;  %v1250_v2 = vmax.f32 %v1239_v58, 0.0  ;;  %v1391_v57 = vpop.permute.xlu0 %1390 }
 0x9fe   :  { %v1251_v1 = vmax.f32 %v1241_v60, 0.0 }
 0x9ff   :  { %v1252_v3 = vmax.f32 %v1243_v62, 0.0  ;;  %v1396_v62 = vpop.permute.xlu1 %1395 }
 0xa00   :  { %v1260_v4 = vpack.c.bf16 %v1251_v1, %v1249_v63 }
 0xa01   :  { %v1261_v5 = vpack.c.bf16 %v1252_v3, %v1250_v2 }
 0xa03   :  { %1305 = vmatprep.subr.bf16.mxu1 %v1261_v5 }
 0xa04   :  { %1306 = vmatpush1.bf16.msra.mxu1 %v1260_v4 }
 0xa07   :  { %2046 = vmatmul.mubr.msk.bf16.vlgmr.msra.gmra.mrb[44].mxu1 %vm186_vm1, %v2140_v6 }
 0xa08   :  { %1345 = vmatprep.mubr.bf16.mxu1 %v2152_v0 }
 0xa0f   :  { %2047 = vmatmul.mubr.msk.bf16.gmra.mrb[48].mxu1 %vm186_vm1, %v2141_v7 }
 0xa10   :  { %1557 = vmatprep.mubr.bf16.mxu1 %v2152_v0 }
 0xada   :  { %v1337_v9 = vpop.f32.mrb[44].mxu1 }
 0xadb   :  { %v1338_v10 = vadd.f32 %v1337_v9, %v1270_v8  ;;  %v1339_v11 = vpop.f32.mrb[45].mxu1 }
 0xadc   :  { %v1340_v13 = vadd.f32 %v1339_v11, %v1270_v8  ;;  %v1341_v14 = vpop.f32.mrb[46].mxu1  ;;  %v2144_v11 = vld [vmem:[%s2562_s3 + $0xc0] sm:$0xff]  }
 0xadd   :  { %v1342_v15 = vadd.f32 %v1341_v14, %v1275_v12  ;;  %v1343_v16 = vpop.f32.mrb[47].mxu1  ;;  %v1356_v18 = vmax.f32 %v1338_v10, 0.0 }
 0xade   :  { %v1344_v17 = vadd.f32 %v1343_v16, %v1275_v12  ;;  %v1357_v20 = vmax.f32 %v1340_v13, 0.0  ;;  %v2145_v12 = vld [vmem:[%s2562_s3 + $0xc8] sm:$0xff]   ;;  %v1492_v13 = vpop.permute.xlu0 %1491 }
 0xadf   :  { %v1358_v19 = vmax.f32 %v1342_v15, 0.0 }
 0xae0   :  { %v1359_v21 = vmax.f32 %v1344_v17, 0.0  ;;  %v1497_v17 = vpop.permute.xlu1 %1496 }
 0xae1   :  { %v1369_v22 = vpack.c.bf16 %v1358_v19, %v1356_v18 }
 0xae2   :  { %v1370_v24 = vpack.c.bf16 %v1359_v21, %v1357_v20  ;;  %v1347_v25 = vpop.f32.mrb[48].mxu1 }
 0xae3   :  { %v1348_v26 = vadd.f32 %v1347_v25, %v1280_v23  ;;  %v1349_v27 = vpop.f32.mrb[49].mxu1 }
 0xae4   :  { %v1350_v29 = vadd.f32 %v1349_v27, %v1280_v23  ;;  %v1351_v30 = vpop.f32.mrb[50].mxu1  ;;  %1414 = vmatprep.subr.bf16.mxu0 %v1370_v24 }
 0xae5   :  { %v1352_v31 = vadd.f32 %v1351_v30, %v1285_v28  ;;  %v1353_v32 = vpop.f32.mrb[51].mxu1  ;;  %1415 = vmatpush1.bf16.msra.mxu0 %v1369_v22  ;;  %v1360_v34 = vmax.f32 %v1348_v26, 0.0 }
 0xae6   :  { %v1354_v33 = vadd.f32 %v1353_v32, %v1285_v28  ;;  %v1361_v36 = vmax.f32 %v1350_v29, 0.0  ;;  %v1502_v28 = vpop.permute.xlu0 %1501 }
 0xae7   :  { %v1362_v35 = vmax.f32 %v1352_v31, 0.0 }
 0xae8   :  { %v1363_v37 = vmax.f32 %v1354_v33, 0.0  ;;  %v1507_v33 = vpop.permute.xlu1 %1506 }
 0xae9   :  { %v1371_v38 = vpack.c.bf16 %v1362_v35, %v1360_v34 }
 0xaea   :  { %v1372_v39 = vpack.c.bf16 %v1363_v37, %v1361_v36 }
 0xaec   :  { %1416 = vmatprep.subr.bf16.mxu0 %v1372_v39 }
 0xaed   :  { %1417 = vmatpush1.bf16.msra.mxu0 %v1371_v38 }
 0xaf0   :  { %2058 = vmatmul.mubr.msk.bf16.vlgmr.msra.gmra.mrb[44].mxu0 %vm186_vm1, %v2142_v40 }
 0xaf1   :  { %1456 = vmatprep.mubr.bf16.mxu0 %v2152_v0 }
 0xaf8   :  { %2059 = vmatmul.mubr.msk.bf16.gmra.mrb[48].mxu0 %vm186_vm1, %v2143_v41 }
 0xaf9   :  { %1668 = vmatprep.mubr.bf16.mxu0 %v2152_v0 }
 0xbc3   :  { %v1448_v43 = vpop.f32.mrb[44].mxu0 }
 0xbc4   :  { %v1449_v44 = vadd.f32 %v1448_v43, %v1381_v42  ;;  %v1450_v45 = vpop.f32.mrb[45].mxu0 }
 0xbc5   :  { %v1451_v47 = vadd.f32 %v1450_v45, %v1381_v42  ;;  %v1452_v48 = vpop.f32.mrb[46].mxu0  ;;  %v2146_v45 = vld [vmem:[%s2562_s3 + $0xd0] sm:$0xff]  }
 0xbc6   :  { %v1453_v49 = vadd.f32 %v1452_v48, %v1386_v46  ;;  %v1454_v50 = vpop.f32.mrb[47].mxu0  ;;  %v1467_v52 = vmax.f32 %v1449_v44, 0.0 }
 0xbc7   :  { %v1455_v51 = vadd.f32 %v1454_v50, %v1386_v46  ;;  %v1468_v54 = vmax.f32 %v1451_v47, 0.0  ;;  %v2147_v46 = vld [vmem:[%s2562_s3 + $0xd8] sm:$0xff]   ;;  %v1603_v47 = vpop.permute.xlu0 %1602 }
 0xbc8   :  { %v1469_v53 = vmax.f32 %v1453_v49, 0.0 }
 0xbc9   :  { %v1470_v55 = vmax.f32 %v1455_v51, 0.0  ;;  %v1608_v51 = vpop.permute.xlu1 %1607 }
 0xbca   :  { %v1480_v56 = vpack.c.bf16 %v1469_v53, %v1467_v52 }
 0xbcb   :  { %v1481_v58 = vpack.c.bf16 %v1470_v55, %v1468_v54  ;;  %v1458_v59 = vpop.f32.mrb[48].mxu0 }
 0xbcc   :  { %v1459_v60 = vadd.f32 %v1458_v59, %v1391_v57  ;;  %v1460_v61 = vpop.f32.mrb[49].mxu0 }
 0xbcd   :  { %v1461_v63 = vadd.f32 %v1460_v61, %v1391_v57  ;;  %v1462_v1 = vpop.f32.mrb[50].mxu0  ;;  %1525 = vmatprep.subr.bf16.mxu1 %v1481_v58 }
 0xbce   :  { %v1463_v2 = vadd.f32 %v1462_v1, %v1396_v62  ;;  %v1464_v3 = vpop.f32.mrb[51].mxu0  ;;  %1526 = vmatpush1.bf16.msra.mxu1 %v1480_v56  ;;  %v1471_v5 = vmax.f32 %v1459_v60, 0.0 }
 0xbcf   :  { %v1465_v4 = vadd.f32 %v1464_v3, %v1396_v62  ;;  %v1472_v7 = vmax.f32 %v1461_v63, 0.0  ;;  %v1613_v62 = vpop.permute.xlu0 %1612 }
 0xbd0   :  { %v1473_v6 = vmax.f32 %v1463_v2, 0.0 }
 0xbd1   :  { %v1474_v8 = vmax.f32 %v1465_v4, 0.0  ;;  %v1618_v4 = vpop.permute.xlu1 %1617 }
 0xbd2   :  { %v1482_v9 = vpack.c.bf16 %v1473_v6, %v1471_v5 }
 0xbd3   :  { %v1483_v10 = vpack.c.bf16 %v1474_v8, %v1472_v7 }
 0xbd5   :  { %1527 = vmatprep.subr.bf16.mxu1 %v1483_v10 }
 0xbd6   :  { %1528 = vmatpush1.bf16.msra.mxu1 %v1482_v9 }
 0xbd9   :  { %2070 = vmatmul.mubr.msk.bf16.vlgmr.msra.gmra.mrb[52].mxu1 %vm186_vm1, %v2144_v11 }
 0xbda   :  { %1567 = vmatprep.mubr.bf16.mxu1 %v2152_v0 }
 0xbe1   :  { %2071 = vmatmul.mubr.msk.bf16.gmra.mrb[56].mxu1 %vm186_vm1, %v2145_v12 }
 0xbe2   :  { %1779 = vmatprep.mubr.bf16.mxu1 %v2152_v0 }
 0xcac   :  { %v1559_v14 = vpop.f32.mrb[52].mxu1 }
 0xcad   :  { %v1560_v15 = vadd.f32 %v1559_v14, %v1492_v13  ;;  %v1561_v16 = vpop.f32.mrb[53].mxu1 }
 0xcae   :  { %v1562_v18 = vadd.f32 %v1561_v16, %v1492_v13  ;;  %v1563_v19 = vpop.f32.mrb[54].mxu1  ;;  %v2148_v16 = vld [vmem:[%s2562_s3 + $0xe0] sm:$0xff]  }
 0xcaf   :  { %v1564_v20 = vadd.f32 %v1563_v19, %v1497_v17  ;;  %v1565_v21 = vpop.f32.mrb[55].mxu1  ;;  %v1578_v23 = vmax.f32 %v1560_v15, 0.0 }
 0xcb0   :  { %v1566_v22 = vadd.f32 %v1565_v21, %v1497_v17  ;;  %v1579_v25 = vmax.f32 %v1562_v18, 0.0  ;;  %v2149_v17 = vld [vmem:[%s2562_s3 + $0xe8] sm:$0xff]   ;;  %v1714_v18 = vpop.permute.xlu0 %1713 }
 0xcb1   :  { %v1580_v24 = vmax.f32 %v1564_v20, 0.0 }
 0xcb2   :  { %v1581_v26 = vmax.f32 %v1566_v22, 0.0  ;;  %v1719_v22 = vpop.permute.xlu1 %1718 }
 0xcb3   :  { %v1591_v27 = vpack.c.bf16 %v1580_v24, %v1578_v23 }
 0xcb4   :  { %v1592_v29 = vpack.c.bf16 %v1581_v26, %v1579_v25  ;;  %v1569_v30 = vpop.f32.mrb[56].mxu1 }
 0xcb5   :  { %v1570_v31 = vadd.f32 %v1569_v30, %v1502_v28  ;;  %v1571_v32 = vpop.f32.mrb[57].mxu1 }
 0xcb6   :  { %v1572_v34 = vadd.f32 %v1571_v32, %v1502_v28  ;;  %v1573_v35 = vpop.f32.mrb[58].mxu1  ;;  %1636 = vmatprep.subr.bf16.mxu0 %v1592_v29 }
 0xcb7   :  { %v1574_v36 = vadd.f32 %v1573_v35, %v1507_v33  ;;  %v1575_v37 = vpop.f32.mrb[59].mxu1  ;;  %1637 = vmatpush1.bf16.msra.mxu0 %v1591_v27  ;;  %v1582_v39 = vmax.f32 %v1570_v31, 0.0 }
 0xcb8   :  { %v1576_v38 = vadd.f32 %v1575_v37, %v1507_v33  ;;  %v1583_v41 = vmax.f32 %v1572_v34, 0.0  ;;  %v1724_v33 = vpop.permute.xlu0 %1723 }
 0xcb9   :  { %v1584_v40 = vmax.f32 %v1574_v36, 0.0 }
 0xcba   :  { %v1585_v42 = vmax.f32 %v1576_v38, 0.0  ;;  %v1729_v38 = vpop.permute.xlu1 %1728 }
 0xcbb   :  { %v1593_v43 = vpack.c.bf16 %v1584_v40, %v1582_v39 }
 0xcbc   :  { %v1594_v44 = vpack.c.bf16 %v1585_v42, %v1583_v41 }
 0xcbe   :  { %1638 = vmatprep.subr.bf16.mxu0 %v1594_v44 }
 0xcbf   :  { %1639 = vmatpush1.bf16.msra.mxu0 %v1593_v43 }
 0xcc2   :  { %2082 = vmatmul.mubr.msk.bf16.vlgmr.msra.gmra.mrb[52].mxu0 %vm186_vm1, %v2146_v45 }
 0xcc3   :  { %1678 = vmatprep.mubr.bf16.mxu0 %v2152_v0 }
 0xcca   :  { %2083 = vmatmul.mubr.msk.bf16.gmra.mrb[56].mxu0 %vm186_vm1, %v2147_v46 }
 0xccb   :  { %1887 = vmatprep.mubr.bf16.mxu0 %v2152_v0 }
 0xd95   :  { %v1670_v48 = vpop.f32.mrb[52].mxu0 }
 0xd96   :  { %v1671_v49 = vadd.f32 %v1670_v48, %v1603_v47  ;;  %v1672_v50 = vpop.f32.mrb[53].mxu0 }
 0xd97   :  { %v1673_v52 = vadd.f32 %v1672_v50, %v1603_v47  ;;  %v1674_v53 = vpop.f32.mrb[54].mxu0  ;;  %v2150_v50 = vld [vmem:[%s2562_s3 + $0xf0] sm:$0xff]  }
 0xd98   :  { %v1675_v54 = vadd.f32 %v1674_v53, %v1608_v51  ;;  %v1676_v55 = vpop.f32.mrb[55].mxu0  ;;  %v1689_v57 = vmax.f32 %v1671_v49, 0.0 }
 0xd99   :  { %v1677_v56 = vadd.f32 %v1676_v55, %v1608_v51  ;;  %v1690_v59 = vmax.f32 %v1673_v52, 0.0  ;;  %v2151_v51 = vld [vmem:[%s2562_s3 + $0xf8] sm:$0xff]   ;;  %v1825_v52 = vpop.permute.xlu0 %1824 }
 0xd9a   :  { %v1691_v58 = vmax.f32 %v1675_v54, 0.0 }
 0xd9b   :  { %v1692_v60 = vmax.f32 %v1677_v56, 0.0 }
 0xd9c   :  { %v1702_v61 = vpack.c.bf16 %v1691_v58, %v1689_v57 }
 0xd9d   :  { %v1703_v63 = vpack.c.bf16 %v1692_v60, %v1690_v59  ;;  %v1680_v1 = vpop.f32.mrb[56].mxu0 }
 0xd9e   :  { %v1681_v2 = vadd.f32 %v1680_v1, %v1613_v62  ;;  %v1682_v3 = vpop.f32.mrb[57].mxu0 }
 0xd9f   :  { %v1683_v5 = vadd.f32 %v1682_v3, %v1613_v62  ;;  %v1684_v6 = vpop.f32.mrb[58].mxu0  ;;  %1747 = vmatprep.subr.bf16.mxu1 %v1703_v63 }
 0xda0   :  { %v1685_v7 = vadd.f32 %v1684_v6, %v1618_v4  ;;  %v1686_v8 = vpop.f32.mrb[59].mxu0  ;;  %1748 = vmatpush1.bf16.msra.mxu1 %v1702_v61  ;;  %v1693_v10 = vmax.f32 %v1681_v2, 0.0 }
 0xda1   :  { %v1687_v9 = vadd.f32 %v1686_v8, %v1618_v4  ;;  %v1694_v12 = vmax.f32 %v1683_v5, 0.0 }
 0xda2   :  { %v1695_v11 = vmax.f32 %v1685_v7, 0.0 }
 0xda3   :  { %v1696_v13 = vmax.f32 %v1687_v9, 0.0 }
 0xda4   :  { %v1704_v14 = vpack.c.bf16 %v1695_v11, %v1693_v10 }
 0xda5   :  { %v1705_v15 = vpack.c.bf16 %v1696_v13, %v1694_v12 }
 0xda7   :  { %1749 = vmatprep.subr.bf16.mxu1 %v1705_v15 }
 0xda8   :  { %1750 = vmatpush1.bf16.msra.mxu1 %v1704_v14 }
 0xdab   :  { %2094 = vmatmul.mubr.msk.bf16.vlgmr.msra.gmra.mrb[60].mxu1 %vm186_vm1, %v2148_v16 }
 0xdac   :  { %1789 = vmatprep.mubr.bf16.mxu1 %v2152_v0 }
 0xdb3   :  { %2095 = vmatmul.mubr.msk.bf16.gmra.mrb[64].mxu1 %vm186_vm1, %v2149_v17 }
 0xe7e   :  { %v1781_v19 = vpop.f32.mrb[60].mxu1 }
 0xe7f   :  { %v1782_v20 = vadd.f32 %v1781_v19, %v1714_v18  ;;  %v1783_v21 = vpop.f32.mrb[61].mxu1 }
 0xe80   :  { %v1784_v23 = vadd.f32 %v1783_v21, %v1714_v18  ;;  %v1785_v24 = vpop.f32.mrb[62].mxu1 }
 0xe81   :  { %v1786_v25 = vadd.f32 %v1785_v24, %v1719_v22  ;;  %v1787_v26 = vpop.f32.mrb[63].mxu1  ;;  %v1800_v28 = vmax.f32 %v1782_v20, 0.0 }
 0xe82   :  { %v1788_v27 = vadd.f32 %v1787_v26, %v1719_v22  ;;  %v1801_v30 = vmax.f32 %v1784_v23, 0.0 }
 0xe83   :  { %v1802_v29 = vmax.f32 %v1786_v25, 0.0 }
 0xe84   :  { %v1803_v31 = vmax.f32 %v1788_v27, 0.0 }
 0xe85   :  { %v1813_v32 = vpack.c.bf16 %v1802_v29, %v1800_v28 }
 0xe86   :  { %v1814_v34 = vpack.c.bf16 %v1803_v31, %v1801_v30  ;;  %v1791_v35 = vpop.f32.mrb[64].mxu1 }
 0xe87   :  { %v1792_v36 = vadd.f32 %v1791_v35, %v1724_v33  ;;  %v1793_v37 = vpop.f32.mrb[65].mxu1 }
 0xe88   :  { %v1794_v39 = vadd.f32 %v1793_v37, %v1724_v33  ;;  %v1795_v40 = vpop.f32.mrb[66].mxu1  ;;  %1855 = vmatprep.subr.bf16.mxu0 %v1814_v34 }
 0xe89   :  { %v1796_v41 = vadd.f32 %v1795_v40, %v1729_v38  ;;  %v1797_v42 = vpop.f32.mrb[67].mxu1  ;;  %1856 = vmatpush1.bf16.msra.mxu0 %v1813_v32  ;;  %v1804_v44 = vmax.f32 %v1792_v36, 0.0 }
 0xe8a   :  { %v1798_v43 = vadd.f32 %v1797_v42, %v1729_v38  ;;  %v1805_v46 = vmax.f32 %v1794_v39, 0.0 }
 0xe8b   :  { %v1806_v45 = vmax.f32 %v1796_v41, 0.0 }
 0xe8c   :  { %v1807_v47 = vmax.f32 %v1798_v43, 0.0 }
 0xe8d   :  { %v1815_v48 = vpack.c.bf16 %v1806_v45, %v1804_v44 }
 0xe8e   :  { %v1816_v49 = vpack.c.bf16 %v1807_v47, %v1805_v46 }
 0xe90   :  { %1857 = vmatprep.subr.bf16.mxu0 %v1816_v49 }
 0xe91   :  { %1858 = vmatpush1.bf16.msra.mxu0 %v1815_v48 }
 0xe94   :  { %2106 = vmatmul.mubr.msk.bf16.vlgmr.msra.gmra.mrb[60].mxu0 %vm186_vm1, %v2150_v50 }
 0xe95   :  { %1895 = vmatprep.mubr.bf16.mxu0 %v2152_v0 }
 0xe9c   :  { %2107 = vmatmul.mubr.msk.bf16.gmra.mrb[64].mxu0 %vm186_vm1, %v2151_v51 }
 0xf67   :  { %v1889_v53 = vpop.f32.mrb[60].mxu0 }
 0xf68   :  { %v1890_v54 = vadd.f32 %v1889_v53, %v1825_v52  ;;  %v1891_v55 = vpop.f32.mrb[61].mxu0 }
 0xf69   :  { %v1892_v56 = vadd.f32 %v1891_v55, %v1825_v52  ;;  %v1893_v57 = vpop.f32.mrb[62].mxu0 }
 0xf6a   :  { %v1894_v58 = vpop.f32.mrb[63].mxu0 }
 0xf6b   :  { %v1904_v59 = vcombine.low %v1890_v54, %v1892_v56 }
 0xf6d   :  { %2108 = vst.sshfl [vmem:[%s2563_s5] sm:$0x33 pattern:$0x76325410] %v1904_v59 }
 0xf6f   :  { %v1897_v60 = vpop.f32.mrb[64].mxu0 }
 0xf70   :  { %v1898_v0 = vpop.f32.mrb[65].mxu0 }
 0xf71   :  { %v1899_v61 = vpop.f32.mrb[66].mxu0 }
 0xf72   :  { %v1900_v62 = vpop.f32.mrb[67].mxu0 }

</bundles_post_ra>
